<compile_context>
chip_gen: v7x
topology: tpu7x:2x2x1
jax: 0.10.0
libtpu: 0.0.40
codegen_flags: <defaults>
</compile_context>

<pallas_src>
import math
import functools
import numpy as np

import jax
import jax.numpy as jnp
from jax import lax
from jax.experimental import pallas as pl
from jax.experimental.pallas import tpu as pltpu


def _positional_encoding(length, d_model):
    """ESPnet PositionalEncoding table pe[:length, :d_model] (numpy f32)."""
    pos = np.arange(length, dtype=np.float32)[:, None]
    div = np.exp(
        np.arange(0, d_model, 2, dtype=np.float32) * -(math.log(10000.0) / d_model)
    )
    pe = np.zeros((length, d_model), np.float32)
    pe[:, 0::2] = np.sin(pos * div)
    pe[:, 1::2] = np.cos(pos * div)
    return pe


def _conv2d_subsampling_kernel(xo_ref, xe_ref, xh_ref, w1_ref, b1_ref, w2_ref,
                               b2_ref, wl_ref, bl_ref, pe_ref, out_ref,
                               *, F2, Dp, scale):
    """One (batch, time-tile) grid step.

    xo_ref: (Tt, K3) bf16  row j = x[4j+2], x[4j+3], x[4j+4] (odd conv1 taps)
    xe_ref: (Tt, K3) bf16  row j = x[4j],   x[4j+1], x[4j+2] (even conv1 taps)
    xh_ref: (1,  K3) bf16  halo even row (tile row Tt)
    w1_ref: (K3, F1*Dp) bf16   conv1 Toeplitz (kh folded into K)
    w2_ref: (9*Dp, Dp)  bf16   conv2, row index (kh*3 + kw)*Dp + c_in
    wl_ref: (F2*Dp, Dp) bf16   Linear weight in (freq, channel) row order
    """
    Tt = out_ref.shape[0]

    # ---- conv1: Conv2d(1, D, 3, stride=2) + ReLU -- ONE matmul + one epilogue.
    xcat = jnp.concatenate([xo_ref[...], xe_ref[...], xh_ref[...]], axis=0)  # (2Tt+1, K3)
    h1 = jnp.dot(xcat, w1_ref[...], preferred_element_type=jnp.float32)
    h1 = jnp.maximum(h1 + b1_ref[...], 0.0).astype(jnp.bfloat16)            # (2Tt+1, F1*Dp)

    h1o = h1[0:Tt, :]              # odd conv1 rows  (starts at 0: aligned)
    h1e = h1[Tt:2 * Tt + 1, :]     # even conv1 rows (starts at Tt: aligned when Tt%8==0)
    # kh taps for conv2.  h1e[1:Tt+1] is a 1-row sublane shift (accepted relayout).
    rows_kh = (h1e[0:Tt, :], h1o, h1e[1:Tt + 1, :])

    w2 = w2_ref[...]               # hoisted out of the unrolled f2 loop
    b2 = b2_ref[...]

    # ---- conv2: Conv2d(D, D, 3, stride=2) + ReLU.  Per freq block: one K=9*Dp
    # matmul (kh,kw folded into K); keep all h2 blocks for a single Linear matmul.
    h2_blocks = []
    for f2 in range(F2):
        c0 = 2 * f2 * Dp           # lane-aligned (Dp % 128 == 0)
        win = jnp.concatenate([rows_kh[0][:, c0:c0 + 3 * Dp],
                               rows_kh[1][:, c0:c0 + 3 * Dp],
                               rows_kh[2][:, c0:c0 + 3 * Dp]], axis=1)       # (Tt, 9*Dp)
        a = jnp.dot(win, w2, preferred_element_type=jnp.float32)
        h2_blocks.append(jnp.maximum(a + b2, 0.0).astype(jnp.bfloat16))
    h2 = jnp.concatenate(h2_blocks, axis=1)                                   # (Tt, F2*Dp)

    # ---- Linear(D*F2, D) as ONE matmul, fused with PositionalEncoding.
    y = jnp.dot(h2, wl_ref[...], preferred_element_type=jnp.float32)          # (Tt, Dp)
    # TODO(synk): dropout inside PositionalEncoding omitted (eval-mode identity).
    out_ref[...] = (y + bl_ref[...]) * scale + pe_ref[...]


def _default_time_tile():
    try:
        kind = jax.devices()[0].device_kind.lower()
    except Exception:
        kind = ""
    # v6e (128 MiB VMEM, 256-wide MXU): larger time tile.  v5e / v7x: 128.
    return 256 if "v6" in kind else 128


def conv2d_subsampling(x, x_mask, params, *, time_tile=None):
    """x: (B, T, idim) f32, x_mask: (B, 1, T) bool or None.
    params: PyTorch-layout (w1, b1, w2, b2, wl, bl)."""
    w1, b1, w2, b2, wl, bl = params
    B, T, idim = x.shape
    D = int(w1.shape[0])                        # odim
    T1 = (T - 1) // 2
    F1 = (idim - 1) // 2
    T2 = (T1 - 1) // 2
    F2 = (F1 - 1) // 2
    assert T2 >= 1 and F2 >= 1, "input too small for two stride-2 3x3 convs"

    if time_tile is None:
        time_tile = _default_time_tile()
    time_tile = max(8, (int(time_tile) // 8) * 8)
    Tt = max(8, min(time_tile, -(-T2 // 8) * 8))   # multiple of 8 => aligned parity slices
    nT = -(-T2 // Tt)
    T2p = nT * Tt
    K3 = 3 * idim
    Dp = -(-D // 128) * 128                        # lane-aligned channel padding

    # ---- host glue: pack weights into matmul-friendly, lane-padded layouts.
    w1_np = np.asarray(w1, np.float32)          # (D, 1, 3, 3)  OIHW
    w2_np = np.asarray(w2, np.float32)          # (D, D, 3, 3)  OIHW
    wl_np = np.asarray(wl, np.float32)          # (D, D*F2)

    W1 = np.zeros((K3, F1 * Dp), np.float32)    # conv1 Toeplitz, kh folded into K
    for kh in range(3):
        for f1 in range(F1):
            for kw in range(3):
                W1[kh * idim + 2 * f1 + kw, f1 * Dp:f1 * Dp + D] = w1_np[:, 0, kh, kw]

    W2 = np.zeros((9 * Dp, Dp), np.float32)     # conv2, row (kh*3+kw)*Dp + c_in
    for kh in range(3):
        for kw in range(3):
            r0 = (kh * 3 + kw) * Dp
            W2[r0:r0 + D, :D] = w2_np[:, :, kh, kw].T

    # PyTorch flattens conv2 output as (channel, freq); ours is (freq, channel).
    WL = np.zeros((F2 * Dp, Dp), np.float32)
    wl_t = np.transpose(wl_np.reshape(D, D, F2), (2, 1, 0))       # (freq, in, out)
    for f2 in range(F2):
        WL[f2 * Dp:f2 * Dp + D, :D] = wl_t[f2]

    b1_t = np.zeros((1, F1 * Dp), np.float32)
    for f1 in range(F1):
        b1_t[0, f1 * Dp:f1 * Dp + D] = np.asarray(b1, np.float32)
    b2_t = np.zeros((1, Dp), np.float32); b2_t[0, :D] = np.asarray(b2, np.float32)
    bl_t = np.zeros((1, Dp), np.float32); bl_t[0, :D] = np.asarray(bl, np.float32)
    pe = np.zeros((T2p, Dp), np.float32)
    pe[:T2, :D] = _positional_encoding(T2, D)
    pe_t = pe.reshape(nT, Tt, Dp)

    # ---- device glue: stride-2 time taps as contiguous K=3*idim slabs.
    # No haloed gather: the halo is a tiny separate (B, nT, 1, K3) input.
    xb = x.astype(jnp.bfloat16)
    xe = jnp.concatenate([xb[:, 0:4 * T2 + 1:4], xb[:, 1:4 * T2 + 2:4],
                          xb[:, 2:4 * T2 + 3:4]], axis=-1)        # (B, T2+1, K3)
    xo = jnp.concatenate([xb[:, 2:4 * T2 - 1:4], xb[:, 3:4 * T2:4],
                          xb[:, 4:4 * T2 + 1:4]], axis=-1)        # (B, T2,   K3)
    xe_pad = jnp.pad(xe, ((0, 0), (0, T2p - T2), (0, 0)))         # (B, T2p+1, K3)
    xe_main = xe_pad[:, :T2p].reshape(B, nT, Tt, K3)
    xe_halo = xe_pad[:, Tt::Tt].reshape(B, nT, 1, K3)
    xo_main = jnp.pad(xo, ((0, 0), (0, T2p - T2), (0, 0))).reshape(B, nT, Tt, K3)

    W1d = jnp.asarray(W1, jnp.bfloat16)
    W2d = jnp.asarray(W2, jnp.bfloat16)
    WLd = jnp.asarray(WL, jnp.bfloat16)
    b1d, b2d, bld, ped = map(jnp.asarray, (b1_t, b2_t, bl_t, pe_t))

    resident = pl.Buffered(buffer_count=1)      # invariant operands: single-buffer
    in_specs = [
        pl.BlockSpec((None, None, Tt, K3), lambda b, n: (b, n, 0, 0)),   # xo
        pl.BlockSpec((None, None, Tt, K3), lambda b, n: (b, n, 0, 0)),   # xe
        pl.BlockSpec((None, None, 1, K3), lambda b, n: (b, n, 0, 0)),    # halo
        pl.BlockSpec((K3, F1 * Dp), lambda b, n: (0, 0), pipeline_mode=resident),
        pl.BlockSpec((1, F1 * Dp), lambda b, n: (0, 0), pipeline_mode=resident),
        pl.BlockSpec((9 * Dp, Dp), lambda b, n: (0, 0), pipeline_mode=resident),
        pl.BlockSpec((1, Dp), lambda b, n: (0, 0), pipeline_mode=resident),
        pl.BlockSpec((F2 * Dp, Dp), lambda b, n: (0, 0), pipeline_mode=resident),
        pl.BlockSpec((1, Dp), lambda b, n: (0, 0), pipeline_mode=resident),
        pl.BlockSpec((None, Tt, Dp), lambda b, n: (n, 0, 0)),            # pe
    ]
    out_specs = pl.BlockSpec((None, None, Tt, Dp), lambda b, n: (b, n, 0, 0))

    # ---- honest VMEM budget, clamped to the chip (v7x has only 64 MiB).
    BF16, F32 = 2, 4
    try:
        vmem_cap = int(getattr(pltpu.get_tpu_info(), "vmem_capacity_bytes", 64 << 20))
    except Exception:
        vmem_cap = 64 << 20
    weight_bytes = (W1.size + W2.size + WL.size) * BF16 \
        + (b1_t.size + b2_t.size + bl_t.size) * F32
    tile_io = (2 * Tt + 1) * K3 * BF16 + 2 * Tt * Dp * F32           # xo+xe+halo, pe+out
    interm = (2 * Tt + 1) * F1 * Dp * (F32 + BF16) \
        + 2 * Tt * 9 * Dp * BF16 \
        + 2 * Tt * F2 * Dp * BF16 + 2 * Tt * Dp * F32
    budget = 2 * tile_io + weight_bytes + int(1.5 * interm) + (8 << 20)
    vmem_limit = int(min(max(budget, 32 << 20), (vmem_cap * 7) // 8))

    flops = int(B * nT * (2 * (2 * Tt + 1) * K3 * (F1 * Dp)          # conv1
                          + 2 * Tt * F2 * (9 * Dp) * Dp              # conv2
                          + 2 * Tt * (F2 * Dp) * Dp))                # linear
    bytes_accessed = int((xo_main.size + xe_main.size + xe_halo.size) * BF16
                         + B * pe_t.size * F32 + weight_bytes
                         + B * T2p * Dp * F32)

    kernel = functools.partial(_conv2d_subsampling_kernel,
                               F2=F2, Dp=Dp, scale=math.sqrt(D))
    y_t = pl.pallas_call(
        kernel,
        out_shape=jax.ShapeDtypeStruct((B, nT, Tt, Dp), jnp.float32),
        grid=(B, nT),
        in_specs=in_specs,
        out_specs=out_specs,
        compiler_params=pltpu.CompilerParams(
            dimension_semantics=("parallel", "parallel"),
            vmem_limit_bytes=vmem_limit),
        cost_estimate=pl.CostEstimate(flops=flops, transcendentals=0,
                                      bytes_accessed=bytes_accessed),
    )(xo_main, xe_main, xe_halo, W1d, b1d, W2d, b2d, WLd, bld, ped)

    y = y_t.reshape(B, T2p, Dp)[:, :T2, :D]

    if x_mask is None:
        return y, None
    return y, x_mask[:, :, :-2:2][:, :, :-2:2]


def _reference(x, x_mask, params):
    """Plain-JAX mirror of the PyTorch forward (for validation)."""
    w1, b1, w2, b2, wl, bl = params
    D = w1.shape[0]
    y = x[:, None, :, :]
    y = lax.conv_general_dilated(y, w1, (2, 2), "VALID",
                                 dimension_numbers=("NCHW", "OIHW", "NCHW"))
    y = jnp.maximum(y + b1[None, :, None, None], 0.0)
    y = lax.conv_general_dilated(y, w2, (2, 2), "VALID",
                                 dimension_numbers=("NCHW", "OIHW", "NCHW"))
    y = jnp.maximum(y + b2[None, :, None, None], 0.0)
    B, C, T2, F2 = y.shape
    y = jnp.transpose(y, (0, 2, 1, 3)).reshape(B, T2, C * F2)
    y = y @ wl.T + bl
    y = y * math.sqrt(D) + jnp.asarray(_positional_encoding(T2, D))[None]
    if x_mask is None:
        return y, None
    return y, x_mask[:, :, :-2:2][:, :, :-2:2]


if __name__ == "__main__":
    B, T, idim, odim = 2, 16, 16, 32
    F2 = ((idim - 1) // 2 - 1) // 2

    key = jax.random.PRNGKey(0)
    k = jax.random.split(key, 7)
    x = jax.random.normal(k[0], (B, T, idim), jnp.float32)
    x_mask = jnp.ones((B, 1, T), dtype=bool)

    # Deterministic synthetic parameters (PyTorch layout / shapes).
    w1 = 0.2 * jax.random.normal(k[1], (odim, 1, 3, 3), jnp.float32)
    b1 = 0.1 * jax.random.normal(k[2], (odim,), jnp.float32)
    w2 = 0.05 * jax.random.normal(k[3], (odim, odim, 3, 3), jnp.float32)
    b2 = 0.1 * jax.random.normal(k[4], (odim,), jnp.float32)
    wl = 0.05 * jax.random.normal(k[5], (odim, odim * F2), jnp.float32)
    bl = 0.1 * jax.random.normal(k[6], (odim,), jnp.float32)
    params = (w1, b1, w2, b2, wl, bl)

    y, mask = conv2d_subsampling(x, x_mask, params)
    y = jax.block_until_ready(y)

    y_ref, mask_ref = _reference(x, x_mask, params)
    # bf16 inputs/weights with f32 accumulation -> loose-ish tolerance.
    np.testing.assert_allclose(np.asarray(y), np.asarray(y_ref),
                               rtol=1e-1, atol=5e-2)
    assert y.shape == (B, T // 4 - 1, odim)
    assert mask.shape == mask_ref.shape and bool(jnp.all(mask == mask_ref))

    print("KERNEL_OK")
</pallas_src>

<mosaic_0001>
module attributes {stable_mosaic.version = 11 : i64} {
  func.func @_conv2d_subsampling_kernel(%arg0: i32, %arg1: i32, %arg2: memref<1x1x8x48xbf16, #tpu.memory_space<vmem>>, %arg3: memref<1x1x8x48xbf16, #tpu.memory_space<vmem>>, %arg4: memref<1x1x1x48xbf16, #tpu.memory_space<vmem>>, %arg5: memref<48x896xbf16, #tpu.memory_space<vmem>>, %arg6: memref<1x896xf32, #tpu.memory_space<vmem>>, %arg7: memref<1152x128xbf16, #tpu.memory_space<vmem>>, %arg8: memref<1x128xf32, #tpu.memory_space<vmem>>, %arg9: memref<384x128xbf16, #tpu.memory_space<vmem>>, %arg10: memref<1x128xf32, #tpu.memory_space<vmem>>, %arg11: memref<1x8x128xf32, #tpu.memory_space<vmem>>, %arg12: memref<1x1x8x128xf32, #tpu.memory_space<vmem>>) attributes {dimension_semantics = [#tpu.dimension_semantics<parallel>, #tpu.dimension_semantics<parallel>], iteration_bounds = array<i64: 2, 1>, scalar_prefetch = 0 : i64, scratch_operands = 0 : i64, tpu.core_type = #tpu.core_type<tc>, window_params = [{transform_indices = @transform_0, window_bounds = array<i64: 1, 1, 8, 48>}, {transform_indices = @transform_1, window_bounds = array<i64: 1, 1, 8, 48>}, {transform_indices = @transform_2, window_bounds = array<i64: 1, 1, 1, 48>}, {pipeline_mode = #tpu.pipeline_mode<synchronous>, transform_indices = @transform_3, window_bounds = array<i64: 48, 896>}, {pipeline_mode = #tpu.pipeline_mode<synchronous>, transform_indices = @transform_4, window_bounds = array<i64: 1, 896>}, {pipeline_mode = #tpu.pipeline_mode<synchronous>, transform_indices = @transform_5, window_bounds = array<i64: 1152, 128>}, {pipeline_mode = #tpu.pipeline_mode<synchronous>, transform_indices = @transform_6, window_bounds = array<i64: 1, 128>}, {pipeline_mode = #tpu.pipeline_mode<synchronous>, transform_indices = @transform_7, window_bounds = array<i64: 384, 128>}, {pipeline_mode = #tpu.pipeline_mode<synchronous>, transform_indices = @transform_8, window_bounds = array<i64: 1, 128>}, {transform_indices = @transform_9, window_bounds = array<i64: 1, 8, 128>}, {transform_indices = @transform_10, window_bounds = array<i64: 1, 1, 8, 128>}]} {
    %c0 = arith.constant 0 : index
    %c0_0 = arith.constant 0 : index
    %c0_1 = arith.constant 0 : index
    %c0_2 = arith.constant 0 : index
    %0 = vector.load %arg2[%c0, %c0_0, %c0_1, %c0_2] : memref<1x1x8x48xbf16, #tpu.memory_space<vmem>>, vector<1x1x8x48xbf16>
    %1 = vector.shape_cast %0 : vector<1x1x8x48xbf16> to vector<8x48xbf16>
    %c0_3 = arith.constant 0 : index
    %c0_4 = arith.constant 0 : index
    %c0_5 = arith.constant 0 : index
    %c0_6 = arith.constant 0 : index
    %2 = vector.load %arg3[%c0_3, %c0_4, %c0_5, %c0_6] : memref<1x1x8x48xbf16, #tpu.memory_space<vmem>>, vector<1x1x8x48xbf16>
    %3 = vector.shape_cast %2 : vector<1x1x8x48xbf16> to vector<8x48xbf16>
    %c0_7 = arith.constant 0 : index
    %c0_8 = arith.constant 0 : index
    %c0_9 = arith.constant 0 : index
    %c0_10 = arith.constant 0 : index
    %4 = vector.load %arg4[%c0_7, %c0_8, %c0_9, %c0_10] : memref<1x1x1x48xbf16, #tpu.memory_space<vmem>>, vector<1x1x1x48xbf16>
    %5 = vector.shape_cast %4 : vector<1x1x1x48xbf16> to vector<1x48xbf16>
    %6 = tpu.concatenate %1, %3, %5 in 0 : vector<8x48xbf16>, vector<8x48xbf16>, vector<1x48xbf16> -> vector<17x48xbf16>
    %c0_11 = arith.constant 0 : index
    %c0_12 = arith.constant 0 : index
    %7 = vector.load %arg5[%c0_11, %c0_12] : memref<48x896xbf16, #tpu.memory_space<vmem>>, vector<48x896xbf16>
    %cst = arith.constant dense<0.000000e+00> : vector<17x896xf32>
    %8 = tpu.matmul %6, %7, %cst {dimension_numbers = #tpu.dot_dimension_numbers<[1], [0], [0], [1], [0, 0, 1, 1], [], []>} : vector<17x48xbf16>, vector<48x896xbf16>, vector<17x896xf32> -> vector<17x896xf32>
    %c0_13 = arith.constant 0 : index
    %c0_14 = arith.constant 0 : index
    %9 = vector.load %arg6[%c0_13, %c0_14] : memref<1x896xf32, #tpu.memory_space<vmem>>, vector<1x896xf32>
    %10 = vector.broadcast %9 : vector<1x896xf32> to vector<17x896xf32>
    %11 = arith.addf %8, %10 : vector<17x896xf32>
    %cst_15 = arith.constant 0.000000e+00 : f32
    %12 = vector.broadcast %cst_15 : f32 to vector<17x896xf32>
    %13 = arith.maximumf %11, %12 : vector<17x896xf32>
    %14 = arith.truncf %13 : vector<17x896xf32> to vector<17x896xbf16>
    %15 = vector.extract_strided_slice %14 {offsets = [0, 0], sizes = [8, 896], strides = [1, 1]} : vector<17x896xbf16> to vector<8x896xbf16>
    %16 = vector.extract_strided_slice %14 {offsets = [8, 0], sizes = [9, 896], strides = [1, 1]} : vector<17x896xbf16> to vector<9x896xbf16>
    %17 = vector.extract_strided_slice %16 {offsets = [0, 0], sizes = [8, 896], strides = [1, 1]} : vector<9x896xbf16> to vector<8x896xbf16>
    %18 = vector.extract_strided_slice %16 {offsets = [1, 0], sizes = [8, 896], strides = [1, 1]} : vector<9x896xbf16> to vector<8x896xbf16>
    %c0_16 = arith.constant 0 : index
    %c0_17 = arith.constant 0 : index
    %19 = vector.load %arg7[%c0_16, %c0_17] : memref<1152x128xbf16, #tpu.memory_space<vmem>>, vector<1152x128xbf16>
    %c0_18 = arith.constant 0 : index
    %c0_19 = arith.constant 0 : index
    %20 = vector.load %arg8[%c0_18, %c0_19] : memref<1x128xf32, #tpu.memory_space<vmem>>, vector<1x128xf32>
    %21 = vector.extract_strided_slice %17 {offsets = [0, 0], sizes = [8, 384], strides = [1, 1]} : vector<8x896xbf16> to vector<8x384xbf16>
    %22 = vector.extract_strided_slice %15 {offsets = [0, 0], sizes = [8, 384], strides = [1, 1]} : vector<8x896xbf16> to vector<8x384xbf16>
    %23 = vector.extract_strided_slice %18 {offsets = [0, 0], sizes = [8, 384], strides = [1, 1]} : vector<8x896xbf16> to vector<8x384xbf16>
    %24 = tpu.concatenate %21, %22, %23 in 1 : vector<8x384xbf16>, vector<8x384xbf16>, vector<8x384xbf16> -> vector<8x1152xbf16>
    %cst_20 = arith.constant dense<0.000000e+00> : vector<8x128xf32>
    %25 = tpu.matmul %24, %19, %cst_20 {dimension_numbers = #tpu.dot_dimension_numbers<[1], [0], [0], [1], [0, 0, 1, 1], [], []>} : vector<8x1152xbf16>, vector<1152x128xbf16>, vector<8x128xf32> -> vector<8x128xf32>
    %26 = vector.broadcast %20 : vector<1x128xf32> to vector<8x128xf32>
    %27 = arith.addf %25, %26 : vector<8x128xf32>
    %cst_21 = arith.constant 0.000000e+00 : f32
    %28 = vector.broadcast %cst_21 : f32 to vector<8x128xf32>
    %29 = arith.maximumf %27, %28 : vector<8x128xf32>
    %30 = arith.truncf %29 : vector<8x128xf32> to vector<8x128xbf16>
    %31 = vector.extract_strided_slice %17 {offsets = [0, 256], sizes = [8, 384], strides = [1, 1]} : vector<8x896xbf16> to vector<8x384xbf16>
    %32 = vector.extract_strided_slice %15 {offsets = [0, 256], sizes = [8, 384], strides = [1, 1]} : vector<8x896xbf16> to vector<8x384xbf16>
    %33 = vector.extract_strided_slice %18 {offsets = [0, 256], sizes = [8, 384], strides = [1, 1]} : vector<8x896xbf16> to vector<8x384xbf16>
    %34 = tpu.concatenate %31, %32, %33 in 1 : vector<8x384xbf16>, vector<8x384xbf16>, vector<8x384xbf16> -> vector<8x1152xbf16>
    %cst_22 = arith.constant dense<0.000000e+00> : vector<8x128xf32>
    %35 = tpu.matmul %34, %19, %cst_22 {dimension_numbers = #tpu.dot_dimension_numbers<[1], [0], [0], [1], [0, 0, 1, 1], [], []>} : vector<8x1152xbf16>, vector<1152x128xbf16>, vector<8x128xf32> -> vector<8x128xf32>
    %36 = vector.broadcast %20 : vector<1x128xf32> to vector<8x128xf32>
    %37 = arith.addf %35, %36 : vector<8x128xf32>
    %cst_23 = arith.constant 0.000000e+00 : f32
    %38 = vector.broadcast %cst_23 : f32 to vector<8x128xf32>
    %39 = arith.maximumf %37, %38 : vector<8x128xf32>
    %40 = arith.truncf %39 : vector<8x128xf32> to vector<8x128xbf16>
    %41 = vector.extract_strided_slice %17 {offsets = [0, 512], sizes = [8, 384], strides = [1, 1]} : vector<8x896xbf16> to vector<8x384xbf16>
    %42 = vector.extract_strided_slice %15 {offsets = [0, 512], sizes = [8, 384], strides = [1, 1]} : vector<8x896xbf16> to vector<8x384xbf16>
    %43 = vector.extract_strided_slice %18 {offsets = [0, 512], sizes = [8, 384], strides = [1, 1]} : vector<8x896xbf16> to vector<8x384xbf16>
    %44 = tpu.concatenate %41, %42, %43 in 1 : vector<8x384xbf16>, vector<8x384xbf16>, vector<8x384xbf16> -> vector<8x1152xbf16>
    %cst_24 = arith.constant dense<0.000000e+00> : vector<8x128xf32>
    %45 = tpu.matmul %44, %19, %cst_24 {dimension_numbers = #tpu.dot_dimension_numbers<[1], [0], [0], [1], [0, 0, 1, 1], [], []>} : vector<8x1152xbf16>, vector<1152x128xbf16>, vector<8x128xf32> -> vector<8x128xf32>
    %46 = vector.broadcast %20 : vector<1x128xf32> to vector<8x128xf32>
    %47 = arith.addf %45, %46 : vector<8x128xf32>
    %cst_25 = arith.constant 0.000000e+00 : f32
    %48 = vector.broadcast %cst_25 : f32 to vector<8x128xf32>
    %49 = arith.maximumf %47, %48 : vector<8x128xf32>
    %50 = arith.truncf %49 : vector<8x128xf32> to vector<8x128xbf16>
    %51 = tpu.concatenate %30, %40, %50 in 1 : vector<8x128xbf16>, vector<8x128xbf16>, vector<8x128xbf16> -> vector<8x384xbf16>
    %c0_26 = arith.constant 0 : index
    %c0_27 = arith.constant 0 : index
    %52 = vector.load %arg9[%c0_26, %c0_27] : memref<384x128xbf16, #tpu.memory_space<vmem>>, vector<384x128xbf16>
    %cst_28 = arith.constant dense<0.000000e+00> : vector<8x128xf32>
    %53 = tpu.matmul %51, %52, %cst_28 {dimension_numbers = #tpu.dot_dimension_numbers<[1], [0], [0], [1], [0, 0, 1, 1], [], []>} : vector<8x384xbf16>, vector<384x128xbf16>, vector<8x128xf32> -> vector<8x128xf32>
    %c0_29 = arith.constant 0 : index
    %c0_30 = arith.constant 0 : index
    %54 = vector.load %arg10[%c0_29, %c0_30] : memref<1x128xf32, #tpu.memory_space<vmem>>, vector<1x128xf32>
    %55 = vector.broadcast %54 : vector<1x128xf32> to vector<8x128xf32>
    %56 = arith.addf %53, %55 : vector<8x128xf32>
    %cst_31 = arith.constant 5.65685415 : f32
    %57 = vector.broadcast %cst_31 : f32 to vector<8x128xf32>
    %58 = arith.mulf %56, %57 : vector<8x128xf32>
    %c0_32 = arith.constant 0 : index
    %c0_33 = arith.constant 0 : index
    %c0_34 = arith.constant 0 : index
    %59 = vector.load %arg11[%c0_32, %c0_33, %c0_34] : memref<1x8x128xf32, #tpu.memory_space<vmem>>, vector<1x8x128xf32>
    %60 = vector.shape_cast %59 : vector<1x8x128xf32> to vector<8x128xf32>
    %61 = arith.addf %58, %60 : vector<8x128xf32>
    %c0_35 = arith.constant 0 : index
    %c0_36 = arith.constant 0 : index
    %c0_37 = arith.constant 0 : index
    %c0_38 = arith.constant 0 : index
    %62 = vector.load %arg12[%c0_35, %c0_36, %c0_37, %c0_38] : memref<1x1x8x128xf32, #tpu.memory_space<vmem>>, vector<1x1x8x128xf32>
    %63 = vector.shape_cast %62 : vector<1x1x8x128xf32> to vector<8x128xf32>
    %64 = vector.shape_cast %61 : vector<8x128xf32> to vector<1x1x8x128xf32>
    tpu.vector_store %arg12[%c0_35, %c0_36, %c0_37, %c0_38], %64 {strides = array<i32>} : memref<1x1x8x128xf32, #tpu.memory_space<vmem>>, vector<1x1x8x128xf32>,
    return
  }
  func.func @transform_0(%arg0: i32, %arg1: i32) -> (i32, i32, i32, i32) {
    %c0_i32 = arith.constant 0 : i32
    %c0_i32_0 = arith.constant 0 : i32
    %c0_i32_1 = arith.constant 0 : i32
    return %arg0, %arg1, %c0_i32, %c0_i32_0 : i32, i32, i32, i32
  }
  func.func @transform_1(%arg0: i32, %arg1: i32) -> (i32, i32, i32, i32) {
    %c0_i32 = arith.constant 0 : i32
    %c0_i32_0 = arith.constant 0 : i32
    %c0_i32_1 = arith.constant 0 : i32
    return %arg0, %arg1, %c0_i32, %c0_i32_0 : i32, i32, i32, i32
  }
  func.func @transform_2(%arg0: i32, %arg1: i32) -> (i32, i32, i32, i32) {
    %c0_i32 = arith.constant 0 : i32
    %c0_i32_0 = arith.constant 0 : i32
    %c0_i32_1 = arith.constant 0 : i32
    return %arg0, %arg1, %c0_i32, %c0_i32_0 : i32, i32, i32, i32
  }
  func.func @transform_3(%arg0: i32, %arg1: i32) -> (i32, i32) {
    %c0_i32 = arith.constant 0 : i32
    %c0_i32_0 = arith.constant 0 : i32
    %c0_i32_1 = arith.constant 0 : i32
    return %c0_i32, %c0_i32_0 : i32, i32
  }
  func.func @transform_4(%arg0: i32, %arg1: i32) -> (i32, i32) {
    %c0_i32 = arith.constant 0 : i32
    %c0_i32_0 = arith.constant 0 : i32
    %c0_i32_1 = arith.constant 0 : i32
    return %c0_i32, %c0_i32_0 : i32, i32
  }
  func.func @transform_5(%arg0: i32, %arg1: i32) -> (i32, i32) {
    %c0_i32 = arith.constant 0 : i32
    %c0_i32_0 = arith.constant 0 : i32
    %c0_i32_1 = arith.constant 0 : i32
    return %c0_i32, %c0_i32_0 : i32, i32
  }
  func.func @transform_6(%arg0: i32, %arg1: i32) -> (i32, i32) {
    %c0_i32 = arith.constant 0 : i32
    %c0_i32_0 = arith.constant 0 : i32
    %c0_i32_1 = arith.constant 0 : i32
    return %c0_i32, %c0_i32_0 : i32, i32
  }
  func.func @transform_7(%arg0: i32, %arg1: i32) -> (i32, i32) {
    %c0_i32 = arith.constant 0 : i32
    %c0_i32_0 = arith.constant 0 : i32
    %c0_i32_1 = arith.constant 0 : i32
    return %c0_i32, %c0_i32_0 : i32, i32
  }
  func.func @transform_8(%arg0: i32, %arg1: i32) -> (i32, i32) {
    %c0_i32 = arith.constant 0 : i32
    %c0_i32_0 = arith.constant 0 : i32
    %c0_i32_1 = arith.constant 0 : i32
    return %c0_i32, %c0_i32_0 : i32, i32
  }
  func.func @transform_9(%arg0: i32, %arg1: i32) -> (i32, i32, i32) {
    %c0_i32 = arith.constant 0 : i32
    %c0_i32_0 = arith.constant 0 : i32
    %c0_i32_1 = arith.constant 0 : i32
    return %arg1, %c0_i32, %c0_i32_0 : i32, i32, i32
  }
  func.func @transform_10(%arg0: i32, %arg1: i32) -> (i32, i32, i32, i32) {
    %c0_i32 = arith.constant 0 : i32
    %c0_i32_0 = arith.constant 0 : i32
    %c0_i32_1 = arith.constant 0 : i32
    return %arg0, %arg1, %c0_i32, %c0_i32_0 : i32, i32, i32, i32
  }
}

</mosaic_0001>

<bundles_post_ra>
// kernel: tpu_custom_call.1
= control target key start
LH: loop header
LB: loop body
LE: loop exit
PB: predicated region body
PF: predicated region fallthrough
CT: control target
= control target key end

     0   :  { %s4704_s0 = inlined_call_operand.hbm [shape: bf16[2,1,8,48], index: 0, kind: input, shape index: {}]   ;;  %s4705_s1 = inlined_call_operand.hbm [shape: bf16[2,1,8,48], index: 1, kind: input, shape index: {}]   ;;  %s4706_s2 = inlined_call_operand.vmem [shape: bf16[2,1,1,48], index: 2, kind: input, shape index: {}]   ;;  %s4707_s3 = inlined_call_operand.hbm [shape: bf16[48,896], index: 3, kind: input, shape index: {}]   ;;  %s4708_s4 = inlined_call_operand.vmem [shape: f32[1,896], index: 4, kind: input, shape index: {}]   ;;  %s4709_s5 = inlined_call_operand.hbm [shape: bf16[1152,128], index: 5, kind: input, shape index: {}]   ;;  %s4710_s6 = inlined_call_operand.vmem [shape: f32[1,128], index: 6, kind: input, shape index: {}]   ;;  %s4711_s7 = inlined_call_operand.hbm [shape: bf16[384,128], index: 7, kind: input, shape index: {}]   ;;  %s4712_s8 = inlined_call_operand.vmem [shape: f32[1,128], index: 8, kind: input, shape index: {}]   ;;  %s4713_s9 = inlined_call_operand.vmem [shape: f32[1,8,128], index: 9, kind: input, shape index: {}]   ;;  %s4714_s10 = inlined_call_operand.hbm [shape: f32[2,1,8,128], index: 10, kind: output, shape index: {}]  }
   0x1   :  { %4781 = sst [smem:[#allocation51_spill]] %s4707_s3 }
   0x2   :  { %4782 = sst [smem:[#allocation52_spill]] %s4709_s5 }
   0x3   :  { %4783 = sst [smem:[#allocation53_spill]] %s4711_s7 }
   0x4   :  { %4784 = sst [smem:[#allocation54_spill]] %s4712_s8 }
   0x5   :  { %4785 = sst [smem:[#allocation55_spill]] %s4713_s9 }
   0x6   :  { %4786 = sst [smem:[#allocation56_spill]] %s4714_s10 }
   0x7   :  { %15 = vsyncpa [#allocation3], 0 }
   0x8   :  { %17 = vsyncpa [#allocation3 + $0x1], 0 }
   0x9   :  { %18 = vsyncpa [#allocation6], 0 }
   0xa   :  { %20 = vsyncpa [#allocation6 + $0x1], 0 }
   0xb   :  { %21 = vsyncpa [#allocation9], 0 }
   0xc   :  { %22 = vsyncpa [#allocation4], 0 }
   0xd   :  { %24 = vsyncpa [#allocation4 + $0x1], 0  ;;  %s3841_s13 = smov 0   ;;  %s3843_s14 = smov 0  }
   0xe   :  { %s3845_s15 = smov 0   ;;  %s3847_s16 = smov 0  }
   0xf   :  { %s3849_s17 = smov 0   ;;  %s3851_s18 = smov 0  }
  0x10 LB: > { %4787 = sst [smem:[#allocation17_spill]] %s3751_s13  ;;  %s3872_s19 = sadd.s32 4294967295, %s3771_s18   ;;  %s3771_s18 = sphi %s3851_s18, %s30_s18   ;;  %s3767_s17 = sphi %s3849_s17, %s4890_s17   ;;  %s3763_s16 = sphi %s3847_s16, %s4889_s16   ;;  %s3759_s15 = sphi %s3845_s15, %s4888_s15   ;;  %s3755_s14 = sphi %s3843_s14, %s4887_s14   ;;  %s3751_s13 = sphi %s3841_s13, %s4886_s13  }
  0x11   : > { %s2720_s20 = sadd.s32 4294967294, %s3771_s18   ;;  %p64_p0 = scmp.ne.s32.totalorder %s3755_s14, %s3751_s13 }
  0x12   : > { %p4716_p1 = scmp.eq.s32.totalorder %s3872_s19, 0  ;;  %p304_p3 = scmp.eq.s32.totalorder %s2720_s20, 1 }
  0x13   : > { %p2721_p5 = scmp.ge.s32.totalorder %s3771_s18, 1  ;;  %p311_p7 = scmp.lt.s32.totalorder %s3771_s18, 3 }
  0x14   : > { %p3881_p4 = por %p4716_p1, %p64_p0  ;;  %p3886_p6 = por %p304_p3, %p64_p0 }
  0x15   : > { %p3891_p8 = pnand %p2721_p5, %p311_p7  ;;  %s3773_s24 = smov [#allocation7]  }
  0x16   : > { %s4788_s21 = scalar_select %p3881_p4, 1, 0 }
  0x17   : > { %s4789_s22 = scalar_select %p3886_p6, 1, 0 }
  0x18   : > { %s4791_s23 = scalar_select %p3891_p8, 1, 0 }
  0x19   : > { %4790 = sst [smem:[#allocation18_spill]] %s4789_s22  ;;  %s323_s25 = sshll.u32 %s3773_s24, 4  ;;  %s3895_s25 = int_to_ptr.vmem [resolvable:$true] %s323_s25 }
  0x1a   : > { %p3305_p9 = pneg %p3891_p8  ;;  %s3774_s27 = smov [#allocation8]  }
  0x1b   : > { %s339_s28 = sshll.u32 %s3774_s27, 4  ;;  %s4793_s3 = sld [smem:[#allocation51_spill]]  ;;  %s3906_s28 = int_to_ptr.vmem [resolvable:$true] %s339_s28 }
  0x1c   : > { %p3902_p11 = pnand %p3305_p9, %p4716_p1 }
  0x1e   : > { %p3916_p13 = pneg %p3902_p11 }
  0x21   : > { %s3533_s11 = scalar_lea.hbm %s4793_s3, 2688 }
  0x22   : > { %p3534_p12 = scmp.ne.s32.totalorder %s4793_s3, %s3533_s11  ;;  %p3540_p5 = scmp.lt.u32.totalorder %s3533_s11, %s4793_s3 }
  0x24   : > { %p3536_p0 = pnand %p3916_p13, %p3534_p12 }
  0x26   : > { %p3537_p3 = pneg %p3536_p0 }
  0x28   : > { %p3542_p7 = pnand %p3540_p5, %p3537_p3 }
  0x2a   : > { %3545 = shalt.err (!%p3542_p7)
}
  0x2b   : > { %s3546_s29 = scalar_lea.vmem %s3895_s25, 2688  ;;  %p3554_p2 = scmp.lt.s32.totalorder %s3895_s25, %s3895_s25 }
  0x2c   : > { %p3547_p9 = scmp.ne.s32.totalorder %s3895_s25, %s3546_s29  ;;  %p3555_p6 = scmp.lt.s32.totalorder %s3546_s29, %s3546_s29 }
  0x2e   : > { %p3549_p10 = pnand %p3547_p9, %p3916_p13  ;;  %p3556_p12 = por %p3555_p6, %p3554_p2 }
  0x30   : > { %p3550_p1 = pneg %p3549_p10 }
  0x32   : > { %p3557_p0 = pnand %p3556_p12, %p3550_p1 }
  0x34   : > { %3560 = shalt.err (!%p3557_p0)
}
  0x35   : > { %s3775_s30 = smov 448   ;;  %s3776_s22 = smov 28  }
  0x36   : > { %3308 = dma.hbm_to_vmem [thread:$0]  (!%p3902_p11), %s4793_s3, 2688, %s3895_s25, [#allocation6], %s3775_s30, %s3775_s30, %s3776_s22  }
  0x37   : > { %s4795_s5 = sld [smem:[#allocation52_spill]] }
  0x3d   : > { %s3561_s13 = scalar_lea.hbm %s4795_s5, 9216 }
  0x3e   : > { %p3562_p2 = scmp.ne.s32.totalorder %s4795_s5, %s3561_s13  ;;  %p3568_p10 = scmp.lt.u32.totalorder %s3561_s13, %s4795_s5 }
  0x40   : > { %p3564_p1 = pnand %p3562_p2, %p3916_p13 }
  0x42   : > { %p3565_p6 = pneg %p3564_p1 }
  0x44   : > { %p3570_p3 = pnand %p3568_p10, %p3565_p6 }
  0x46   : > { %3573 = shalt.err (!%p3570_p3)
}
  0x47   : > { %s3574_s25 = scalar_lea.vmem %s3906_s28, 9216  ;;  %p3582_p12 = scmp.lt.s32.totalorder %s3906_s28, %s3906_s28 }
  0x48   : > { %p3575_p5 = scmp.ne.s32.totalorder %s3906_s28, %s3574_s25  ;;  %p3583_p0 = scmp.lt.s32.totalorder %s3574_s25, %s3574_s25 }
  0x4a   : > { %p3577_p7 = pnand %p3575_p5, %p3916_p13  ;;  %p3584_p2 = por %p3583_p0, %p3582_p12 }
  0x4c   : > { %p3578_p9 = pneg %p3577_p7 }
  0x4e   : > { %p3585_p1 = pnand %p3584_p2, %p3578_p9 }
  0x50   : > { %3588 = shalt.err (!%p3585_p1)
}
  0x51   : > { %s3777_s9 = smov 64   ;;  %s3778_s8 = smov 4  }
  0x52   : > { %3311 = dma.hbm_to_vmem [thread:$0]  (!%p3902_p11), %s4795_s5, 9216, %s3906_s28, [#allocation9], %s3777_s9, %s3777_s9, %s3778_s8  }
  0x53   : > { %s3779_s30 = smov [#allocation10]   ;;  %s4796_s7 = sld [smem:[#allocation53_spill]] }
  0x54   : > { %s355_s22 = sshll.u32 %s3779_s30, 4  ;;  %s356_s22 = int_to_ptr.vmem [resolvable:$true] %s355_s22 }
  0x59   : > { %s3589_s20 = scalar_lea.hbm %s4796_s7, 3072 }
  0x5a   : > { %p3590_p6 = scmp.ne.s32.totalorder %s4796_s7, %s3589_s20  ;;  %p3596_p5 = scmp.lt.u32.totalorder %s3589_s20, %s4796_s7 }
  0x5c   : > { %p3592_p10 = pnand %p3590_p6, %p3916_p13 }
  0x5e   : > { %p3593_p3 = pneg %p3592_p10 }
  0x60   : > { %p3598_p7 = pnand %p3596_p5, %p3593_p3 }
  0x62   : > { %3601 = shalt.err (!%p3598_p7)
}
  0x63   : > { %s3602_s28 = scalar_lea.vmem %s356_s22, 3072  ;;  %p3610_p2 = scmp.lt.s32.totalorder %s356_s22, %s356_s22 }
  0x64   : > { %p3603_p9 = scmp.ne.s32.totalorder %s356_s22, %s3602_s28  ;;  %p3611_p1 = scmp.lt.s32.totalorder %s3602_s28, %s3602_s28 }
  0x66   : > { %p3605_p12 = pnand %p3603_p9, %p3916_p13  ;;  %p3612_p4 = por %p3611_p1, %p3610_p2 }
  0x68   : > { %p3606_p0 = pneg %p3605_p12 }
  0x6a   : > { %p3613_p8 = pnand %p3612_p4, %p3606_p0 }
  0x6c   : > { %3616 = shalt.err (!%p3613_p8)
}
  0x6d   : > { %3314 = dma.hbm_to_vmem [thread:$0]  (!%p3902_p11), %s4796_s7, 3072, %s356_s22, [#allocation9], %s3777_s9, %s3777_s9, %s3778_s8  }
  0x6e   : > { %s42_s3 = sadd.s32 1, %s3767_s17  ;;  %s51_s24 = sadd.s32 1, %s3759_s15 }
  0x6f   : > { %p44_p4 = scmp.ge.s32.totalorder %s42_s3, 2  ;;  %p58_p8 = scmp.ne.s32.totalorder %s3759_s15, %s3755_s14 }
  0x70   : > { %p59_p13 = scmp.eq.s32.totalorder %s3771_s18, 0  ;;  %p4799_p10 = scmp.eq.s32.totalorder %s3872_s19, 1 }
  0x71   : > { %s4892_s3 = smov (%p44_p4, %s42_s3), 0  ;;  %p3329_p11 = scmp.lt.s32.totalorder %s3771_s18, 2 }
  0x72   : > { %4797 = sst [smem:[#allocation19_spill]] %s4892_s3  ;;  %p3985_p6 = por %p59_p13, %p58_p8 }
  0x73   : > { %p3991_p3 = por %p4799_p10, %p58_p8  ;;  %s46_s9 = ssub.s32 %s3767_s17, %s4892_s3 }
  0x74   : > { %p49_p5 = scmp.eq.s32.totalorder %s46_s9, 0  ;;  %s379_s8 = sand.u32 1, %s3759_s15  }
  0x75   : > { %s4800_s30 = scalar_select %p3991_p3, 1, 0 }
  0x76   : > { %s3999_s22 = sshll.u32 %s379_s8, 2  ;;  %s2728_s12 = sshll.u32 %s3767_s17, 6 }
  0x77   : > { %s4002_s11 = scalar_select %p49_p5, %s3759_s15, %s51_s24  }
  0x78   : > { %s4008_s29 = scalar_lea.hbm %s4704_s0, %s2728_s12  ;;  %s383_s25 = scalar_lea.vmem [#allocation2], %s3999_s22 }
  0x79   : > { %s391_s28 = sshll.u32 %s383_s25, 4  ;;  %p4015_p7 = pnand %p3329_p11, %p3985_p6  ;;  %s4011_s28 = int_to_ptr.vmem [resolvable:$true] %s391_s28 }
  0x7a   : > { %s4022_s9 = scalar_lea.hbm %s4705_s1, %s2728_s12  ;;  %s398_s20 = sand.u32 1, %s3771_s18  }
  0x7b   : > { %s380_s27 = scalar_lea.sflag [#allocation3], %s379_s8  ;;  %s3617_s5 = scalar_lea.hbm %s4008_s29, 64 }
  0x7c   : > { %p3618_p9 = scmp.ne.s32.totalorder %s4008_s29, %s3617_s5  ;;  %p3619_p12 = pneg %p4015_p7 }
  0x7d   : > { %s3622_s7 = scalar_lea.hbm %s4704_s0, 128  ;;  %p3623_p1 = scmp.lt.u32.totalorder %s4008_s29, %s4704_s0 }
  0x7e   : > { %p3620_p0 = pnand %p3619_p12, %p3618_p9  ;;  %p3624_p4 = scmp.lt.u32.totalorder %s3622_s7, %s3617_s5 }
  0x7f   : > { %p3626_p13 = scmp.lt.u32.totalorder %s3617_s5, %s4008_s29 }
  0x80   : > { %p3621_p2 = pneg %p3620_p0  ;;  %p3625_p8 = por %p3624_p4, %p3623_p1 }
  0x82   : > { %p3627_p6 = por %p3626_p13, %p3625_p8 }
  0x84   : > { %p3628_p10 = pnand %p3627_p6, %p3621_p2 }
  0x86   : > { %3631 = shalt.err (!%p3628_p10)
}
  0x87   : > { %s3632_s8 = scalar_lea.vmem %s4011_s28, 64  ;;  %s3780_s12 = smov [#allocation2]  }
  0x88   : > { %p3633_p11 = scmp.ne.s32.totalorder %s4011_s28, %s3632_s8  ;;  %s3637_s24 = sshll.u32 %s3780_s12, 4  ;;  %s3638_s24 = int_to_ptr.vmem [resolvable:$false] %s3637_s24 }
  0x89   : > { %s3639_s3 = scalar_lea.vmem %s3638_s24, 128  ;;  %p3640_p0 = scmp.lt.s32.totalorder %s4011_s28, %s3638_s24 }
  0x8a   : > { %p3635_p5 = pnand %p3633_p11, %p3619_p12  ;;  %p3641_p1 = scmp.lt.s32.totalorder %s3639_s3, %s3632_s8 }
  0x8c   : > { %p3636_p9 = pneg %p3635_p5  ;;  %p3642_p4 = por %p3641_p1, %p3640_p0 }
  0x8e   : > { %p3643_p8 = pnand %p3642_p4, %p3636_p9 }
  0x90   : > { %3646 = shalt.err (!%p3643_p8)
}
  0x91   : > { %3318 = dma.hbm_to_vmem [thread:$0]  (!%p4015_p7), %s4008_s29, 64, %s4011_s28, %s380_s27  }
  0x92   : > { %s402_s5 = scalar_lea.vmem [#allocation5], %s3999_s22  ;;  %s399_s26 = scalar_lea.sflag [#allocation6], %s398_s20 }
  0x93   : > { %s410_s7 = sshll.u32 %s402_s5, 4  ;;  %s3647_s25 = scalar_lea.hbm %s4022_s9, 64  ;;  %s411_s7 = int_to_ptr.vmem [resolvable:$true] %s410_s7 }
  0x94   : > { %p3648_p2 = scmp.ne.s32.totalorder %s4022_s9, %s3647_s25  ;;  %s3652_s12 = scalar_lea.hbm %s4705_s1, 128 }
  0x95   : > { %p3653_p10 = scmp.lt.u32.totalorder %s4022_s9, %s4705_s1  ;;  %p3654_p11 = scmp.lt.u32.totalorder %s3652_s12, %s3647_s25 }
  0x96   : > { %p3650_p13 = pnand %p3648_p2, %p3619_p12  ;;  %p3656_p9 = scmp.lt.u32.totalorder %s3647_s25, %s4022_s9 }
  0x97   : > { %p3655_p5 = por %p3654_p11, %p3653_p10 }
  0x98   : > { %p3651_p6 = pneg %p3650_p13 }
  0x99   : > { %p3657_p0 = por %p3656_p9, %p3655_p5 }
  0x9b   : > { %p3658_p1 = pnand %p3657_p0, %p3651_p6 }
  0x9d   : > { %3661 = shalt.err (!%p3658_p1)
}
  0x9e   : > { %s3662_s22 = scalar_lea.vmem %s411_s7, 64  ;;  %s3781_s29 = smov [#allocation5]  }
  0x9f   : > { %p3663_p4 = scmp.ne.s32.totalorder %s411_s7, %s3662_s22  ;;  %s3667_s28 = sshll.u32 %s3781_s29, 4  ;;  %s3668_s28 = int_to_ptr.vmem [resolvable:$false] %s3667_s28 }
  0xa0   : > { %s3669_s20 = scalar_lea.vmem %s3668_s28, 128  ;;  %p3670_p13 = scmp.lt.s32.totalorder %s411_s7, %s3668_s28 }
  0xa1   : > { %p3665_p8 = pnand %p3663_p4, %p3619_p12  ;;  %p3671_p3 = scmp.lt.s32.totalorder %s3669_s20, %s3662_s22 }
  0xa3   : > { %p3666_p2 = pneg %p3665_p8  ;;  %p3672_p10 = por %p3671_p3, %p3670_p13 }
  0xa5   : > { %p3673_p11 = pnand %p3672_p10, %p3666_p2 }
  0xa7   : > { %3676 = shalt.err (!%p3673_p11)
}
  0xa8   : > { %3321 = dma.hbm_to_vmem [thread:$0]  (!%p4015_p7), %s4022_s9, 64, %s411_s7, %s399_s26  }
  0xa9   : > { %p4802_p6 = scmp.ne.s32.totalorder %s4791_s23, 0 }
  0xab   : > { %428 = sbr.rel (%p4802_p6) target bundleno = 1103 (0x44f), region = 60 }
  0xb2   : > { %s4075_s27 = sand.u32 1, %s3755_s14   ;;  %p4803_p12 = scmp.ne.s32.totalorder %s4788_s21, 0 }
  0xb3   : > { %s2732_s5 = sshll.u32 %s4075_s27, 2  ;;  %s431_s25 = scalar_lea.sflag [#allocation3], %s4075_s27 }
  0xb4   : > { %s434_s13 = scalar_lea.vmem [#allocation2], %s2732_s5 }
  0xb5   : > { %3730 = dma.done.wait (%p4803_p12), %s431_s25, 64  }
  0xb6   : > { %3732 = vsyncadd (%p4803_p12), %s431_s25, 4294967232  ;;  %s439_s10 = sand.u32 1, %s3872_s19   ;;  %s443_s23 = scalar_lea.vmem [#allocation5], %s2732_s5 }
  0xb7   : > { %s440_s9 = scalar_lea.sflag [#allocation6], %s439_s10 }
  0xb8   : > { %3734 = dma.done.wait (%p4803_p12), %s440_s9, 64  }
  0xb9   : > { %3736 = vsyncadd (%p4803_p12), %s440_s9, 4294967232  ;;  %p4804_p3 = scmp.eq.s32.totalorder %s3872_s19, 0 }
  0xbb   : > { %3738 = dma.done.wait (%p4804_p3), [#allocation6], 2688   ;;  %p4805_p7 = pmov %p4804_p3 }
  0xbc   : > { %p4806_p5 = pmov %p4804_p3 }
  0xbd   : > { %3740 = vsyncadd (%p4805_p7), [#allocation6], 4294964608 }
  0xbe   : > { %3742 = dma.done.wait (%p4806_p5), [#allocation9], 12288   ;;  %p4807_p9 = pmov %p4804_p3 }
  0xbf   : > { %v3782_v0 = vmov 0   ;;  %v3392_v1 = vld [vmem:[#allocation7 + $0x4] ss:$28 sps:$4 sm:$0xff]   ;;  %v3395_v3 = vld [vmem:[#allocation7 + $0x3c] ss:$28 sps:$4 sm:$0xff]   ;;  %p507_p0 = scmp.lt.s32.totalorder %s3763_s16, 1  ;;  %v554_v60 = vlaneseq }
  0xc0   : > { %3744 = vsyncadd (%p4807_p9), [#allocation9], 4294955008  ;;  %735 = vmatprep.mubr.bf16.mxu1 %v3782_v0  ;;  %837 = vmatprep.mubr.bf16.mxu0 %v3782_v0  ;;  %v3394_v2 = vld [vmem:[#allocation7] ss:$28 sps:$4 sm:$0xff]   ;;  %v3397_v4 = vld [vmem:[#allocation7 + $0x38] ss:$28 sps:$4 sm:$0xff]  }
  0xc1   : > { %703 = vmatprep.subr.bf16.mxu1 %v3392_v1  ;;  %v3398_v5 = vld [vmem:[#allocation7 + $0x74] ss:$28 sps:$4 sm:$0xff]   ;;  %v3401_v8 = vld [vmem:[%s443_s23] ss:$0 sps:$4 sm:$0xff]   ;;  %vm524_vm0 = vcmask 1043456   ;;  %s508_s19 = scalar_select %p507_p0, %s3763_s16, 1 }
  0xc2   : > { %704 = vmatpush1.bf16.msra.mxu1 %v3394_v2  ;;  %v3400_v6 = vld [vmem:[#allocation7 + $0x70] ss:$28 sps:$4 sm:$0xff]   ;;  %vm697_vm1 = vcmask 392192   ;;  %v3402_v13 = vld [vmem:[#allocation7 + $0x8] ss:$28 sps:$4 sm:$0xff]   ;;  %v4121_v28 = vld [vmem:[#allocation8 + $0x50] sm:$0xff]  }
  0xc3   : > { %705 = vmatprep.subr.bf16.mxu1 %v3395_v3  ;;  %v518_v7 = vld [vmem:[%s434_s13] sm:$0xf]  ;;  %v3404_v9 = vld [vmem:[#allocation7 + $0xc] ss:$28 sps:$4 sm:$0xff]   ;;  %v3407_v15 = vld [vmem:[#allocation7 + $0x44] ss:$28 sps:$4 sm:$0xff]   ;;  %s512_s26 = scalar_lea.vmem %s4706_s2, %s508_s19 }
  0xc4   : > { %v3411_v10 = vld [vmem:[#allocation7 + $0x14] ss:$28 sps:$4 sm:$0xff]   ;;  %v4100_v12 = vsel %vm524_vm0, %v518_v7, %v3401_v8  ;;  %v3414_v14 = vld [vmem:[#allocation7 + $0x4c] ss:$28 sps:$4 sm:$0xff]   ;;  %v3417_v17 = vld [vmem:[#allocation7 + $0x84] ss:$28 sps:$4 sm:$0xff]  }
  0xc5   : > { %v3413_v11 = vld [vmem:[#allocation7 + $0x10] ss:$28 sps:$4 sm:$0xff]   ;;  %805 = vmatprep.subr.bf16.mxu0 %v3411_v10  ;;  %v3416_v16 = vld [vmem:[#allocation7 + $0x48] ss:$28 sps:$4 sm:$0xff]   ;;  %v3405_v18 = vld [vmem:[#allocation7 + $0x40] ss:$28 sps:$4 sm:$0xff]  }
  0xc6   : > { %706 = vmatpush1.bf16.msra.mxu1 %v3397_v4  ;;  %806 = vmatpush1.bf16.msra.mxu0 %v3413_v11  ;;  %v3410_v19 = vld [vmem:[#allocation7 + $0x7c] ss:$28 sps:$4 sm:$0xff]   ;;  %v520_v20 = vld [vmem:[%s512_s26] sm:$0x1]  ;;  %v3423_v22 = vld [vmem:[#allocation8 + $0x40] sm:$0xff]   ;;  %v4220_v61 = vshrl.u32 %v554_v60, 7 }
  0xc7   : > { %707 = vmatprep.subr.bf16.mxu1 %v3398_v5  ;;  %807 = vmatprep.subr.bf16.mxu0 %v3414_v14  ;;  %v3419_v21 = vld [vmem:[#allocation7 + $0x80] ss:$28 sps:$4 sm:$0xff]   ;;  %v3408_v23 = vld [vmem:[#allocation7 + $0x78] ss:$28 sps:$4 sm:$0xff]   ;;  %v4108_v25 = vld [vmem:[#allocation8] sm:$0xff]   ;;  %vm3784_vm3 = vmmov 0  }
  0xc8   : > { %v3420_v24 = vld [vmem:[#allocation7 + $0x18] ss:$28 sps:$4 sm:$0xff]   ;;  %v3421_v29 = vld [vmem:[#allocation7 + $0x50] ss:$28 sps:$4 sm:$0xff]   ;;  %v3422_v31 = vld [vmem:[#allocation7 + $0x88] ss:$28 sps:$4 sm:$0xff]  }
  0xc9   : > { %v4111_v26 = vld [vmem:[#allocation8 + $0x48] sm:$0xff]   ;;  %v4124_v30 = vld [vmem:[#allocation8 + $0x10] sm:$0xff]   ;;  %v4129_v32 = vld [vmem:[#allocation8 + $0x58] sm:$0xff]   ;;  %v556_v62 = vsub.s32 0, %v4220_v61  ;;  %v572_v10 = vsub.s32 4, %v4220_v61  ;;  %s4877_s28 = sld [smem:[#allocation54_spill]] }
  0xca   : > { %708 = vmatpush1.bf16.msra.mxu1 %v3400_v6  ;;  %808 = vmatpush1.bf16.msra.mxu0 %v3416_v16  ;;  %v4118_v27 = vld [vmem:[#allocation8 + $0x8] sm:$0xff]   ;;  %v4132_v33 = vld [vmem:[#allocation8 + $0x18] sm:$0xff]   ;;  %v4135_v34 = vld [vmem:[#allocation8 + $0x60] sm:$0xff]   ;;  %vm1090_vm2 = vsmask.f32 7424  ;;  %s2737_s20 = sshll.u32 %s4075_s27, 3 }
  0xcb   : > { %754 = vmatprep.subr.bf16.mxu1 %v3404_v9  ;;  %809 = vmatprep.subr.bf16.mxu0 %v3417_v17  ;;  %v4139_v35 = vld [vmem:[#allocation8 + $0xc0] sm:$0xff]   ;;  %v4152_v38 = vld [vmem:[#allocation8 + $0xc8] sm:$0xff]   ;;  %v4165_v42 = vld [vmem:[#allocation8 + $0xd0] sm:$0xff]   ;;  %s4878_s13 = sld [smem:[#allocation55_spill]]  ;;  %s2867_s10 = sshll.u32 %s3763_s16, 7 }
  0xcc   : > { %v4141_v36 = vld [vmem:[#allocation8 + $0x20] sm:$0xff]   ;;  %v4154_v39 = vld [vmem:[#allocation8 + $0x88] sm:$0xff]   ;;  %v4168_v43 = vld [vmem:[#allocation8 + $0x90] sm:$0xff]   ;;  %s506_s9 = scalar_lea.vmem [#allocation11], %s2737_s20  ;;  %s4879_s7 = sld [smem:[#allocation56_spill]] }
  0xcd   : > { %2760 = vmatmul.mubr.msk.bf16.vlgmr.msra.gmra.mrb[0].mxu1 %vm697_vm1, %v4100_v12  ;;  %v4149_v37 = vld [vmem:[#allocation8 + $0x80] sm:$0xff]   ;;  %v4160_v40 = vld [vmem:[#allocation8 + $0x68] sm:$0xff]   ;;  %v4171_v44 = vld [vmem:[#allocation8 + $0x70] sm:$0xff]   ;;  %s2560_s23 = sshll.u32 %s506_s9, 4  ;;  %s2546_s8 = scalar_lea.sflag [#allocation4], %s4075_s27  ;;  %s4657_s23 = int_to_ptr.vmem [resolvable:$true] %s2560_s23 }
  0xce   : > { %755 = vmatpush1.bf16.msra.mxu1 %v3402_v13  ;;  %745 = vmatprep.mubr.bf16.mxu1 %v3782_v0  ;;  %v4162_v41 = vld [vmem:[#allocation8 + $0x28] sm:$0xff]   ;;  %v4174_v45 = vld [vmem:[#allocation8 + $0x30] sm:$0xff]   ;;  %v4177_v46 = vld [vmem:[#allocation8 + $0xd8] sm:$0xff]   ;;  %s3677_s12 = scalar_lea.vmem %s4657_s23, 128  ;;  %p4880_p4 = scmp.ne.s32.totalorder %s4800_s30, 0 }
  0xcf   : > { %756 = vmatprep.subr.bf16.mxu1 %v3407_v15  ;;  %810 = vmatpush1.bf16.msra.mxu0 %v3419_v21  ;;  %v4180_v47 = vld [vmem:[#allocation8 + $0x98] sm:$0xff]   ;;  %v4189_v50 = vld [vmem:[#allocation8 + $0xe0] sm:$0xff]   ;;  %v4199_v53 = vld [vmem:[#allocation8 + $0xe8] sm:$0xff]   ;;  %v564_v21 = vsub.s32 2, %v4220_v61  ;;  %p3678_p1 = scmp.ne.s32.totalorder %s4657_s23, %s3677_s12  ;;  %s3785_s16 = smov [#allocation11]  }
  0xd0   : > { %2875 = vmatprep.subr.bf16.mxu0 %v3423_v22  ;;  %v4183_v48 = vld [vmem:[#allocation8 + $0x78] sm:$0xff]   ;;  %v4192_v51 = vld [vmem:[#allocation8 + $0xa0] sm:$0xff]   ;;  %v4201_v54 = vld [vmem:[#allocation8 + $0xa8] sm:$0xff]   ;;  %v568_v22 = vsub.s32 3, %v4220_v61  ;;  %s3681_s24 = sshll.u32 %s3785_s16, 4  ;;  %s3682_s24 = int_to_ptr.vmem [resolvable:$false] %s3681_s24 }
  0xd1   : > { %v4186_v49 = vld [vmem:[#allocation8 + $0x38] sm:$0xff]   ;;  %v4195_v52 = vld [vmem:[#allocation8 + $0x140] sm:$0xff]   ;;  %4808 = vst [vmem:[#allocation20_spill] sm:$0xff] %v4201_v54  ;;  %v4205_v55 = vld [vmem:[#allocation8 + $0xf0] sm:$0xff]   ;;  %p3679_p8 = pnand %p3678_p1, %p4880_p4  ;;  %s3683_s3 = scalar_lea.vmem %s3682_s24, 256 }
  0xd2   : > { %757 = vmatpush1.bf16.msra.mxu1 %v3405_v18  ;;  %2764 = vmatmul.mubr.msk.bf16.vlgmr.msra.gmra.mrb[0].mxu0 %vm697_vm1, %v4100_v12  ;;  %4809 = vst [vmem:[#allocation21_spill] sm:$0xff] %v4205_v55  ;;  %v4207_v56 = vld [vmem:[#allocation8 + $0xb0] sm:$0xff]   ;;  %v4211_v57 = vld [vmem:[#allocation8 + $0xf8] sm:$0xff]   ;;  %v4217_v59 = vld [vmem:[#allocation8 + $0x1c0] sm:$0xff]   ;;  %s4655_s26 = scalar_lea.hbm %s4879_s7, %s2867_s10  ;;  %p3684_p13 = scmp.lt.s32.totalorder %s4657_s23, %s3682_s24 }
  0xd3   : > { %758 = vmatprep.subr.bf16.mxu1 %v3410_v19  ;;  %847 = vmatprep.mubr.bf16.mxu0 %v3782_v0  ;;  %4810 = vst [vmem:[#allocation22_spill] sm:$0xff] %v4207_v56  ;;  %4811 = vst [vmem:[#allocation23_spill] sm:$0xff] %v4211_v57  ;;  %v4213_v58 = vld [vmem:[#allocation8 + $0xb8] sm:$0xff]   ;;  %v4226_v63 = vld [vmem:[%s4708_s4] sm:$0xff]  ;;  %p3680_p2 = pneg %p3679_p8  ;;  %p3685_p10 = scmp.lt.s32.totalorder %s3683_s3, %s3677_s12 }
  0xd4   : > { %2876 = vmatpush3.bf16.msra.mxu0 %v4108_v25  ;;  %4812 = vst [vmem:[#allocation24_spill] sm:$0xff] %v4213_v58  ;;  %4813 = vst [vmem:[#allocation25_spill] sm:$0xff] %v4217_v59  ;;  %v557_v1 = vrot.slane %v4226_v63, %v556_v62  ;;  %v4234_v18 = vrot.slane %v4226_v63, %v572_v10  ;;  %v4247_v10 = vld [vmem:[#allocation8 + $0x148] sm:$0xff]  }
  0xd5   : > { %2761 = vmatmul.mubr.msk.bf16.gmra.mrb[4].mxu1 %vm697_vm1, %v520_v20  ;;  %2877 = vmatprep.subr.bf16.mxu0 %v4111_v26  ;;  %p3686_p11 = por %p3685_p10, %p3684_p13 }
  0xd6   : > { %759 = vmatpush1.bf16.msra.mxu1 %v3408_v23  ;;  %786 = vmatprep.mubr.bf16.mxu1 %v3782_v0 }
  0xd7   : > { %3197 = vmatprep.subr.bf16.mxu1 %v3420_v24  ;;  %p3687_p6 = pnand %p3686_p11, %p3680_p2 }
  0xd8   : > { %2878 = vmatpush3.bf16.msra.mxu0 %v4118_v27 }
  0xd9   : > { %2879 = vmatprep.subr.bf16.mxu0 %v4121_v28 }
  0xda   : > { %2765 = vmatmul.mubr.msk.bf16.gmra.mrb[4].mxu0 %vm697_vm1, %v520_v20 }
  0xdc   : > { %2880 = vmatpush3.bf16.msra.mxu0 %v4124_v30 }
  0xdd   : > { %2762 = vmatmul.mubr.msk.bf16.vlgmr.msra.gmra.mrb[8].mxu1 %vm697_vm1, %v4100_v12  ;;  %2881 = vmatprep.subr.bf16.mxu0 %v4129_v32 }
  0xde   : > { %796 = vmatprep.mubr.bf16.mxu1 %v3782_v0  ;;  %3198 = vmatpush3.bf16.msra.mxu1 %v3420_v24  ;;  %v560_v0 = vsub.s32 1, %v4220_v61 }
  0xdf   : > { %3199 = vmatprep.subr.bf16.mxu1 %v3421_v29 }
  0xe0   : > { %2882 = vmatpush3.bf16.msra.mxu0 %v4132_v33  ;;  %v561_v2 = vrot.slane %v4226_v63, %v560_v0 }
  0xe1   : > { %2883 = vmatprep.subr.bf16.mxu0 %v4135_v34 }
  0xe2   : > { %3200 = vmatpush3.bf16.msra.mxu1 %v3421_v29 }
  0xe3   : > { %3201 = vmatprep.subr.bf16.mxu1 %v3422_v31 }
  0xe4   : > { %2884 = vmatpush3.bf16.msra.mxu0 %v4141_v36 }
  0xe5   : > { %2763 = vmatmul.mubr.msk.bf16.gmra.mrb[12].mxu1 %vm697_vm1, %v520_v20  ;;  %2885 = vmatprep.subr.bf16.mxu0 %v4160_v40 }
  0xe6   : > { %3202 = vmatpush3.bf16.msra.mxu1 %v3422_v31  ;;  %3203 = vmatprep.mubr.msk.bf16.mxu1 %vm697_vm1, %v4100_v12  ;;  %v576_v12 = vsub.s32 5, %v4220_v61 }
  0xe7   : > { %2897 = vmatprep.subr.bf16.mxu1 %v4139_v35 }
  0xe8   : > { %2886 = vmatpush3.bf16.msra.mxu0 %v4162_v41  ;;  %v4241_v23 = vrot.slane %v4226_v63, %v576_v12 }
  0xe9   : > { %2887 = vmatprep.subr.bf16.mxu0 %v4171_v44 }
  0xec   : > { %2888 = vmatpush3.bf16.msra.mxu0 %v4174_v45 }
  0xed   : > { %3204 = vmatmul.mubr.msk.bf16.vlgmr.msra.gmra.mrb[16].mxu1 %vm697_vm1, %v520_v20  ;;  %2889 = vmatprep.subr.bf16.mxu0 %v4183_v48 }
  0xee   : > { %2898 = vmatpush3.bf16.msra.mxu1 %v4149_v37 }
  0xef   : > { %2899 = vmatprep.subr.bf16.mxu1 %v4152_v38 }
  0xf0   : > { %2890 = vmatpush3.bf16.msra.mxu0 %v4186_v49 }
  0xf1   : > { %2919 = vmatprep.subr.bf16.mxu0 %v4195_v52 }
  0xf2   : > { %2900 = vmatpush3.bf16.msra.mxu1 %v4154_v39 }
  0xf3   : > { %2901 = vmatprep.subr.bf16.mxu1 %v4165_v42 }
  0xf6   : > { %2902 = vmatpush3.bf16.msra.mxu1 %v4168_v43 }
  0xf7   : > { %2903 = vmatprep.subr.bf16.mxu1 %v4177_v46 }
  0xfa   : > { %2904 = vmatpush3.bf16.msra.mxu1 %v4180_v47 }
  0xfb   : > { %2905 = vmatprep.subr.bf16.mxu1 %v4189_v50 }
  0xfe   : > { %2906 = vmatpush3.bf16.msra.mxu1 %v4192_v51 }
  0xff   : > { %2907 = vmatprep.subr.bf16.mxu1 %v4199_v53 }
 0x102   : > { %2908 = vmatpush3.bf16.msra.mxu1 %v4201_v54 }
 0x103   : > { %2909 = vmatprep.subr.bf16.mxu1 %v4205_v55 }
 0x106   : > { %2910 = vmatpush3.bf16.msra.mxu1 %v4207_v56 }
 0x107   : > { %2911 = vmatprep.subr.bf16.mxu1 %v4211_v57 }
 0x10a   : > { %2912 = vmatpush3.bf16.msra.mxu1 %v4213_v58 }
 0x10b   : > { %2941 = vmatprep.subr.bf16.mxu1 %v4217_v59 }
 0x1a0   : > { %v737_v3 = vpop.f32.mrb[0].mxu1 }
 0x1a1   : > { %v738_v4 = vadd.f32 %v737_v3, %v557_v1  ;;  %v739_v5 = vpop.f32.mrb[1].mxu1 }
 0x1a2   : > { %v740_v6 = vadd.f32 %v739_v5, %v561_v2  ;;  %v741_v7 = vpop.f32.mrb[2].mxu1 }
 0x1a3   : > { %v742_v8 = vadd.f32 %v741_v7, %v557_v1  ;;  %v743_v9 = vpop.f32.mrb[3].mxu1  ;;  %v904_v13 = vmax.f32 %v738_v4, 0.0  ;;  %v4245_v4 = vld [vmem:[#allocation8 + $0x100] sm:$0xff]  }
 0x1a4   : > { %v744_v11 = vadd.f32 %v743_v9, %v561_v2  ;;  %v905_v15 = vmax.f32 %v740_v6, 0.0 }
 0x1a5   : > { %v911_v14 = vmax.f32 %v742_v8, 0.0  ;;  %v839_v6 = vpop.f32.mrb[0].mxu0 }
 0x1a6   : > { %v912_v16 = vmax.f32 %v744_v11, 0.0  ;;  %v840_v11 = vadd.f32 %v839_v6, %v4234_v18  ;;  %v841_v12 = vpop.f32.mrb[1].mxu0 }
 0x1a7   : > { %v925_v17 = vpack.c.bf16 %v911_v14, %v904_v13  ;;  %v842_v14 = vadd.f32 %v841_v12, %v4241_v23 }
 0x1a8   : > { %v4236_v19 = vpack.c.bf16 %v912_v16, %v905_v15  ;;  %v747_v20 = vpop.f32.mrb[4].mxu1  ;;  %v843_v15 = vpop.f32.mrb[2].mxu0 }
 0x1a9   : > { %v1087_v24 = vrot.slane %v925_v17, 4  ;;  %v1094_v29 = vshll.u32 %v925_v17, 16  ;;  %v748_v31 = vadd.f32 %v747_v20, %v557_v1  ;;  %v749_v60 = vpop.f32.mrb[5].mxu1  ;;  %v4253_v1 = vrot.slane %v4226_v63, %v564_v21  ;;  %v4261_v21 = vld [vmem:[#allocation8 + $0x108] sm:$0xff]  }
 0x1aa   : > { %v1106_v62 = vshll.u32 %v4236_v19, 16  ;;  %v750_v0 = vadd.f32 %v749_v60, %v561_v2  ;;  %v4723_v3 = vrot.slane %v4236_v19, 4  ;;  %v751_v5 = vpop.f32.mrb[6].mxu1  ;;  %v4256_v2 = vrot.slane %v4226_v63, %v568_v22  ;;  %4814 = vst [vmem:[#allocation26_spill] sm:$0xff] %v4261_v21 }
 0x1ab   : > { %v918_v7 = vmax.f32 %v748_v31, 0.0  ;;  %v1133_v8 = vrot.slane %v1087_v24, 4  ;;  %v752_v9 = vpop.f32.mrb[7].mxu1  ;;  %v1096_v16 = vrot.slane %v1094_v29, 1  ;;  %v908_v31 = vmax.f32 %v840_v11, 0.0  ;;  %v4265_v29 = vld [vmem:[#allocation8 + $0x150] sm:$0xff]  }
 0x1ac   : > { %v919_v13 = vmax.f32 %v750_v0, 0.0  ;;  %1612 = vmatprep.mubr.bf16.mxu0 %v4723_v3  ;;  %v844_v60 = vadd.f32 %v843_v15, %v4234_v18  ;;  %v845_v0 = vpop.f32.mrb[3].mxu0  ;;  %v1108_v5 = vrot.slane %v1106_v62, 1  ;;  %v909_v9 = vmax.f32 %v842_v14, 0.0  ;;  %4815 = vst [vmem:[#allocation27_spill] sm:$0xff] %v4265_v29 }
 0x1ad   : > { %v932_v20 = vpack.c.bf16 %v918_v7, %v918_v7  ;;  %1613 = vmatmul.mubr.bf16.vlgmr.msra.gmra.mrb[8].mxu0 %v1087_v24  ;;  %1652 = vmatprep.mubr.bf16.mxu1 %v1133_v8  ;;  %v846_v22 = vadd.f32 %v845_v0, %v4241_v23  ;;  %v1092_v3 = vshrl.u32 %v925_v17, 16  ;;  %v1104_v7 = vshrl.u32 %v4236_v19, 16 }
 0x1ae   : > { %v933_v6 = vpack.c.bf16 %v919_v13, %v919_v13  ;;  %2920 = vmatpush3.bf16.msra.mxu0 %v4245_v4  ;;  %v915_v24 = vmax.f32 %v844_v60, 0.0  ;;  %v4273_v60 = vld [vmem:[#allocation8 + $0x110] sm:$0xff]  }
 0x1af   : > { %v1099_v12 = vshll.u32 %v932_v20, 16  ;;  %2921 = vmatprep.subr.bf16.mxu0 %v4247_v10  ;;  %v916_v11 = vmax.f32 %v846_v22, 0.0  ;;  %v1097_v13 = vor.u32 %v1096_v16, %v1092_v3  ;;  %4816 = vst [vmem:[#allocation28_spill] sm:$0xff] %v4273_v60  ;;  %v1109_v57 = vor.u32 %v1108_v5, %v1104_v7 }
 0x1b0   : > { %v1111_v8 = vshll.u32 %v933_v6, 16  ;;  %v788_v62 = vpop.f32.mrb[8].mxu1  ;;  %v4269_v58 = vpack.c.bf16 %v915_v24, %v908_v31  ;;  %v849_v6 = vpop.f32.mrb[4].mxu0  ;;  %v4282_v31 = vld [vmem:[#allocation8 + $0x158] sm:$0xff]  }
 0x1b1   : > { %v1101_v15 = vrot.slane %v1099_v12, 1  ;;  %v789_v59 = vadd.f32 %v788_v62, %v4253_v1  ;;  %v790_v14 = vpop.f32.mrb[9].mxu1  ;;  %v4275_v56 = vpack.c.bf16 %v916_v11, %v909_v9  ;;  %4818 = vst [vmem:[#allocation30_spill] sm:$0xff] %v4282_v31  ;;  %v851_v24 = vpop.f32.mrb[5].mxu0 }
 0x1b2   : > { %v1113_v17 = vrot.slane %v1111_v8, 1  ;;  %v791_v20 = vadd.f32 %v790_v14, %v4256_v2  ;;  %2922 = vmatpush3.bf16.msra.mxu0 %v4261_v21  ;;  %v792_v0 = vpop.f32.mrb[10].mxu1  ;;  %v853_v9 = vpop.f32.mrb[6].mxu0  ;;  %v1801_v11 = vshll.u32 %v4269_v58, 16 }
 0x1b3   : > { %4817 = vst [vmem:[#allocation29_spill] sm:$0xff] %v4275_v56  ;;  %v4278_v3 = vsel %vm1090_vm2, %v1097_v13, %v1101_v15  ;;  %v906_v16 = vmax.f32 %v789_v59, 0.0  ;;  %v793_v22 = vadd.f32 %v792_v0, %v4253_v1  ;;  %2923 = vmatprep.subr.bf16.mxu0 %v4265_v29  ;;  %v794_v12 = vpop.f32.mrb[11].mxu1  ;;  %v854_v13 = vpop.f32.mrb[7].mxu0  ;;  %v4288_v59 = vld [vmem:[#allocation8 + $0x118] sm:$0xff]   ;;  %v2029_v14 = vshll.u32 %v4275_v56, 16 }
 0x1b4   : > { %v907_v8 = vmax.f32 %v791_v20, 0.0  ;;  %v795_v62 = vadd.f32 %v794_v12, %v4256_v2  ;;  %v1114_v5 = vsel %vm1090_vm2, %v1109_v57, %v1113_v17  ;;  %4819 = vst [vmem:[#allocation31_spill] sm:$0xff] %v4288_v59  ;;  %v850_v0 = vadd.f32 %v849_v6, %v4234_v18  ;;  %v4294_v57 = vld [vmem:[#allocation8 + $0x160] sm:$0xff]  }
 0x1b5   : > { %v913_v7 = vmax.f32 %v793_v22, 0.0  ;;  %v852_v20 = vadd.f32 %v851_v24, %v4241_v23  ;;  %4820 = vst [vmem:[#allocation32_spill] sm:$0xff] %v4294_v57  ;;  %v1799_v17 = vshrl.u32 %v4269_v58, 16  ;;  %v4299_v12 = vld [vmem:[#allocation8 + $0x180] sm:$0xff]   ;;  %v1137_v13 = vrot.slane %v1114_v5, 4 }
 0x1b6   : > { %2924 = vmatpush3.bf16.msra.mxu0 %v4273_v60  ;;  %v914_v15 = vmax.f32 %v795_v62, 0.0  ;;  %4821 = vst [vmem:[#allocation33_spill] sm:$0xff] %v4299_v12  ;;  %v2027_v62 = vshrl.u32 %v4275_v56, 16  ;;  %v922_v60 = vmax.f32 %v850_v0, 0.0  ;;  %v1803_v56 = vrot.slane %v1801_v11, 1 }
 0x1b7   : > { %v927_v55 = vpack.c.bf16 %v913_v7, %v906_v16  ;;  %2925 = vmatprep.subr.bf16.mxu0 %v4282_v31  ;;  %v4305_v16 = vld [vmem:[#allocation8 + $0x1c8] sm:$0xff]   ;;  %v923_v24 = vmax.f32 %v852_v20, 0.0  ;;  %v2031_v0 = vrot.slane %v2029_v14, 1 }
 0x1b8   : > { %v4297_v22 = vpack.c.bf16 %v914_v15, %v907_v8  ;;  %v798_v9 = vpop.f32.mrb[12].mxu1  ;;  %4822 = vst [vmem:[#allocation34_spill] sm:$0xff] %v4305_v16  ;;  %v4310_v15 = vld [vmem:[#allocation8 + $0x120] sm:$0xff]   ;;  %v4319_v14 = vld [vmem:[#allocation8 + $0x188] sm:$0xff]  }
 0x1b9   : > { %v1118_v54 = vshll.u32 %v927_v55, 16  ;;  %v4302_v18 = vrot.slane %v927_v55, 4  ;;  %v799_v23 = vadd.f32 %v798_v9, %v4253_v1  ;;  %v800_v6 = vpop.f32.mrb[13].mxu1  ;;  %4823 = vst [vmem:[#allocation35_spill] sm:$0xff] %v4310_v15  ;;  %v1116_v31 = vshrl.u32 %v927_v55, 16  ;;  %v4314_v9 = vld [vmem:[#allocation8 + $0x168] sm:$0xff]  }
 0x1ba   : > { %2926 = vmatpush3.bf16.msra.mxu0 %v4288_v59  ;;  %v1789_v8 = vshll.u32 %v4297_v22, 16  ;;  %v801_v7 = vadd.f32 %v800_v6, %v4256_v2  ;;  %v802_v5 = vpop.f32.mrb[14].mxu1  ;;  %v1787_v21 = vshrl.u32 %v4297_v22, 16  ;;  %v937_v6 = vpack.c.bf16 %v923_v24, %v923_v24 }
 0x1bb   : > { %v1120_v29 = vrot.slane %v1118_v54, 1  ;;  %1653 = vmatmul.mubr.bf16.vlgmr.msra.gmra.mrb[20].mxu1 %v4302_v18  ;;  %v920_v1 = vmax.f32 %v799_v23, 0.0  ;;  %2927 = vmatprep.subr.bf16.mxu0 %v4294_v57  ;;  %v4754_v20 = vrot.slane %v4302_v18, 4  ;;  %v803_v59 = vpop.f32.mrb[15].mxu1  ;;  %v936_v54 = vpack.c.bf16 %v922_v60, %v922_v60  ;;  %v4322_v23 = vld [vmem:[#allocation8 + $0x1d0] sm:$0xff]  }
 0x1bc   : > { %v1791_v2 = vrot.slane %v1789_v8, 1  ;;  %2942 = vmatpush3.bf16.msra.mxu1 %v4299_v12  ;;  %1732 = vmatprep.mubr.bf16.mxu1 %v1137_v13  ;;  %v921_v11 = vmax.f32 %v801_v7, 0.0  ;;  %v4327_v8 = vld [vmem:[#allocation8 + $0x128] sm:$0xff]   ;;  %v1804_v5 = vor.u32 %v1803_v56, %v1799_v17  ;;  %v4330_v60 = vld [vmem:[#allocation8 + $0x170] sm:$0xff]   ;;  %v4336_v56 = vld [vmem:[#allocation8 + $0x1d8] sm:$0xff]  }
 0x1bd   : > { %v934_v55 = vpack.c.bf16 %v920_v1, %v920_v1  ;;  %2943 = vmatprep.subr.bf16.mxu1 %v4305_v16  ;;  %1692 = vmatprep.mubr.bf16.mxu0 %v4754_v20  ;;  %v1806_v13 = vshll.u32 %v936_v54, 16  ;;  %v1121_v7 = vor.u32 %v1120_v29, %v1116_v31  ;;  %v2034_v1 = vshll.u32 %v937_v6, 16  ;;  %v4333_v20 = vld [vmem:[#allocation8 + $0x190] sm:$0xff]   ;;  %v4360_v54 = vld [vmem:[#allocation8 + $0x1e0] sm:$0xff]  }
 0x1be   : > { %v935_v59 = vpack.c.bf16 %v921_v11, %v921_v11  ;;  %2928 = vmatpush3.bf16.msra.mxu0 %v4310_v15  ;;  %v2032_v16 = vor.u32 %v2031_v0, %v2027_v62  ;;  %v1792_v11 = vor.u32 %v1791_v2, %v1787_v21  ;;  %v4339_v17 = vld [vmem:[#allocation8 + $0x130] sm:$0xff]   ;;  %v4348_v21 = vld [vmem:[#allocation8 + $0x178] sm:$0xff]   ;;  %v4373_v6 = vld [vmem:[#allocation8 + $0x200] sm:$0xff]  }
 0x1bf   : > { %v1123_v12 = vshll.u32 %v934_v55, 16  ;;  %2929 = vmatprep.subr.bf16.mxu0 %v4314_v9  ;;  %v1808_v24 = vrot.slane %v1806_v13, 1  ;;  %v2036_v29 = vrot.slane %v2034_v1, 1  ;;  %v4370_v55 = vld [vmem:[#allocation8 + $0x1e8] sm:$0xff]   ;;  %4828 = vst [vmem:[#allocation40_spill] sm:$0xff] %v4373_v6  ;;  %v4778_v13 = vmov 0.0  }
 0x1c0   : > { %v1794_v57 = vshll.u32 %v935_v59, 16  ;;  %2944 = vmatpush3.bf16.msra.mxu1 %v4319_v14  ;;  %4827 = vst [vmem:[#allocation39_spill] sm:$0xff] %v4370_v55  ;;  %v4829_v59 = vrot.slane %v4236_v19, 4  ;;  %v4382_v1 = vld [vmem:[#allocation8 + $0x1f0] sm:$0xff]   ;;  %v580_v19 = vsub.s32 6, %v4220_v61 }
 0x1c1   : > { %v1125_v15 = vrot.slane %v1123_v12, 1  ;;  %2945 = vmatprep.subr.bf16.mxu1 %v4322_v23  ;;  %v4342_v62 = vsel %vm1090_vm2, %v1804_v5, %v1808_v24  ;;  %v4351_v12 = vsel %vm1090_vm2, %v2032_v16, %v2036_v29  ;;  %v4367_v16 = vld [vmem:[#allocation8 + $0x1a0] sm:$0xff]   ;;  %4831 = vst [vmem:[#allocation42_spill] sm:$0xff] %v4382_v1  ;;  %v4385_v24 = vld [vmem:[#allocation8 + $0x208] sm:$0xff]  }
 0x1c2   : > { %v1796_v31 = vrot.slane %v1794_v57, 1  ;;  %2930 = vmatpush3.bf16.msra.mxu0 %v4327_v8  ;;  %4824 = vst [vmem:[#allocation36_spill] sm:$0xff] %v4342_v62  ;;  %4825 = vst [vmem:[#allocation37_spill] sm:$0xff] %v4351_v12  ;;  %v4354_v57 = vld [vmem:[#allocation8 + $0x198] sm:$0xff]   ;;  %v1134_v5 = vrot.slane %v4829_v59, 4  ;;  %v581_v59 = vrot.slane %v4226_v63, %v580_v19 }
 0x1c3   : > { %v4345_v0 = vsel %vm1090_vm2, %v1121_v7, %v1125_v15  ;;  %2931 = vmatprep.subr.bf16.mxu0 %v4330_v60  ;;  %v4363_v15 = vld [vmem:[#allocation8 + $0x138] sm:$0xff]   ;;  %4826 = vst [vmem:[#allocation38_spill] sm:$0xff] %v4367_v16  ;;  %v4379_v7 = vld [vmem:[#allocation8 + $0x1a8] sm:$0xff]   ;;  %4832 = vst [vmem:[#allocation43_spill] sm:$0xff] %v4385_v24 }
 0x1c4   : > { %2946 = vmatpush3.bf16.msra.mxu1 %v4333_v20  ;;  %v4357_v2 = vsel %vm1090_vm2, %v1792_v11, %v1796_v31  ;;  %4830 = vst [vmem:[#allocation41_spill] sm:$0xff] %v4379_v7  ;;  %v3205_v11 = vpop.f32.mrb[16].mxu1  ;;  %v4392_v31 = vld [vmem:[#allocation8 + $0x1b0] sm:$0xff]   ;;  %v4396_v12 = vld [vmem:[#allocation8 + $0x1f8] sm:$0xff]  }
 0x1c5   : > { %2947 = vmatprep.subr.bf16.mxu1 %v4336_v56  ;;  %v890_v29 = vpop.f32.mrb[17].mxu1  ;;  %4833 = vst [vmem:[#allocation44_spill] sm:$0xff] %v4392_v31 }
 0x1c6   : > { %2932 = vmatpush3.bf16.msra.mxu0 %v4339_v17  ;;  %v891_v61 = vadd.f32 %v890_v29, %v581_v59  ;;  %v1136_v29 = vrot.slane %v4278_v3, 4 }
 0x1c7   : > { %2933 = vmatprep.subr.bf16.mxu0 %v4348_v21 }
 0x1c8   : > { %2948 = vmatpush3.bf16.msra.mxu1 %v4354_v57  ;;  %v910_v63 = vmax.f32 %v891_v61, 0.0 }
 0x1c9   : > { %2949 = vmatprep.subr.bf16.mxu1 %v4360_v54 }
 0x1ca   : > { %2934 = vmatpush3.bf16.msra.mxu0 %v4363_v15 }
 0x1cb   : > { %3207 = vmatprep.subr.bf16.mxu0 %v4778_v13 }
 0x1cc   : > { %2950 = vmatpush3.bf16.msra.mxu1 %v4367_v16 }
 0x1cd   : > { %1693 = vmatmul.mubr.bf16.vlgmr.msra.gmra.mrb[12].mxu0 %v1134_v5  ;;  %2951 = vmatprep.subr.bf16.mxu1 %v4370_v55  ;;  %v3206_v5 = vpop.f32.mrb[18].mxu1  ;;  %v4399_v55 = vld [vmem:[#allocation8 + $0x210] sm:$0xff]  }
 0x1ce   : > { %3208 = vmatpush3.bf16.msra.mxu0 %v4373_v6  ;;  %3223 = vmatprep.mubr.msk.bf16.mxu0 %vm3784_vm3, %v4778_v13  ;;  %v893_v62 = vpop.f32.mrb[19].mxu1  ;;  %4834 = vst [vmem:[#allocation45_spill] sm:$0xff] %v4399_v55  ;;  %v899_v6 = vadd.f32 %v3205_v11, %v581_v59  ;;  %v4407_v5 = vld [vmem:[#allocation8 + $0x218] sm:$0xff]   ;;  %v4419_v11 = vld [vmem:[#allocation8 + $0x220] sm:$0xff]  }
 0x1cf   : > { %3209 = vmatprep.subr.bf16.mxu0 %v4778_v13  ;;  %v894_v16 = vadd.f32 %v893_v62, %v581_v59  ;;  %4835 = vst [vmem:[#allocation46_spill] sm:$0xff] %v4407_v5  ;;  %4836 = vst [vmem:[#allocation47_spill] sm:$0xff] %v4419_v11  ;;  %v4428_v59 = vld [vmem:[#allocation8 + $0x228] sm:$0xff]  }
 0x1d0   : > { %2952 = vmatpush3.bf16.msra.mxu1 %v4379_v7  ;;  %v4403_v7 = vld [vmem:[#allocation8 + $0x1b8] sm:$0xff]   ;;  %v924_v62 = vmax.f32 %v899_v6, 0.0  ;;  %4837 = vst [vmem:[#allocation48_spill] sm:$0xff] %v4428_v59 }
 0x1d1   : > { %2953 = vmatprep.subr.bf16.mxu1 %v4382_v1  ;;  %v917_v19 = vmax.f32 %v894_v16, 0.0  ;;  %v1784_v16 = vrot.slane %v4297_v22, 4  ;;  %v4859_v22 = vld [vmem:[#allocation41_spill] sm:$0xff] }
 0x1d2   : > { %3210 = vmatpush3.bf16.msra.mxu0 %v4385_v24  ;;  %v938_v6 = vpack.c.bf16 %v924_v62, %v924_v62 }
 0x1d3   : > { %3211 = vmatprep.subr.bf16.mxu0 %v4778_v13  ;;  %v4409_v1 = vpack.c.bf16 %v917_v19, %v910_v63  ;;  %v4435_v19 = vld [vmem:[#allocation8 + $0x230] sm:$0xff]  }
 0x1d4   : > { %2954 = vmatpush3.bf16.msra.mxu1 %v4392_v31  ;;  %v4414_v31 = vld [vmem:[#allocation8 + $0x40] sm:$0xff]   ;;  %v2046_v61 = vshll.u32 %v938_v6, 16  ;;  %v4849_v6 = vld [vmem:[#allocation31_spill] sm:$0xff] }
 0x1d5   : > { %2955 = vmatprep.subr.bf16.mxu1 %v4396_v12  ;;  %v2041_v3 = vshll.u32 %v4409_v1, 16  ;;  %v2039_v63 = vshrl.u32 %v4409_v1, 16 }
 0x1d6   : > { %3212 = vmatpush3.bf16.msra.mxu0 %v4399_v55 }
 0x1d7   : > { %3213 = vmatprep.subr.bf16.mxu0 %v4778_v13 }
 0x1d8   : > { %2956 = vmatpush3.bf16.msra.mxu1 %v4403_v7 }
 0x1d9   : > { %2972 = vmatprep.subr.bf16.mxu1 %v4414_v31 }
 0x1da   : > { %3214 = vmatpush3.bf16.msra.mxu0 %v4407_v5 }
 0x1db   : > { %1733 = vmatmul.mubr.bf16.vlgmr.msra.gmra.mrb[24].mxu1 %v1136_v29  ;;  %3215 = vmatprep.subr.bf16.mxu0 %v4778_v13  ;;  %v4848_v29 = vld [vmem:[#allocation23_spill] sm:$0xff] }
 0x1dc   : > { %2973 = vmatpush3.bf16.msra.mxu1 %v4108_v25  ;;  %1852 = vmatprep.mubr.bf16.mxu1 %v1784_v16  ;;  %v2043_v25 = vrot.slane %v2041_v3, 1  ;;  %v4850_v3 = vld [vmem:[#allocation32_spill] sm:$0xff] }
 0x1dd   : > { %2974 = vmatprep.subr.bf16.mxu1 %v4111_v26  ;;  %v2048_v26 = vrot.slane %v2046_v61, 1  ;;  %v4851_v61 = vld [vmem:[#allocation24_spill] sm:$0xff] }
 0x1de   : > { %3216 = vmatpush3.bf16.msra.mxu0 %v4419_v11  ;;  %v2044_v62 = vor.u32 %v2043_v25, %v2039_v63  ;;  %v4852_v63 = vld [vmem:[#allocation25_spill] sm:$0xff]  ;;  %v4853_v25 = vld [vmem:[#allocation35_spill] sm:$0xff] }
 0x1df   : > { %3217 = vmatprep.subr.bf16.mxu0 %v4778_v13 }
 0x1e0   : > { %2975 = vmatpush3.bf16.msra.mxu1 %v4118_v27  ;;  %v4441_v27 = vld [vmem:[#allocation8 + $0x238] sm:$0xff]  }
 0x1e1   : > { %2976 = vmatprep.subr.bf16.mxu1 %v4121_v28  ;;  %4838 = vst [vmem:[#allocation49_spill] sm:$0xff] %v4441_v27  ;;  %v4446_v28 = vsel %vm1090_vm2, %v2044_v62, %v2048_v26  ;;  %v1812_v26 = vrot.slane %v4357_v2, 4  ;;  %v4854_v62 = vld [vmem:[#allocation33_spill] sm:$0xff]  ;;  %v1810_v2 = vrot.slane %v1784_v16, 4  ;;  %v4860_v16 = vld [vmem:[#allocation42_spill] sm:$0xff] }
 0x1e2   : > { %3218 = vmatpush3.bf16.msra.mxu0 %v4428_v59  ;;  %4839 = vst [vmem:[#allocation50_spill] sm:$0xff] %v4446_v28  ;;  %v4862_v28 = vld [vmem:[#allocation29_spill] sm:$0xff] }
 0x1e3   : > { %3219 = vmatprep.subr.bf16.mxu0 %v4778_v13 }
 0x1e4   : > { %2977 = vmatpush3.bf16.msra.mxu1 %v4124_v30  ;;  %v4771_v30 = vrot.slane %v4345_v0, 4 }
 0x1e5   : > { %2978 = vmatprep.subr.bf16.mxu1 %v4129_v32  ;;  %v4840_v32 = vrot.slane %v4302_v18, 4 }
 0x1e6   : > { %3220 = vmatpush3.bf16.msra.mxu0 %v4435_v19 }
 0x1e7   : > { %3221 = vmatprep.subr.bf16.mxu0 %v4778_v13 }
 0x1e8   : > { %2979 = vmatpush3.bf16.msra.mxu1 %v4132_v33  ;;  %v4466_v33 = vrot.slane %v4269_v58, 4  ;;  %v4846_v58 = vld [vmem:[#allocation30_spill] sm:$0xff] }
 0x1e9   : > { %2980 = vmatprep.subr.bf16.mxu1 %v4135_v34 }
 0x1ea   : > { %3222 = vmatpush3.bf16.msra.mxu0 %v4441_v27  ;;  %v4770_v34 = vrot.slane %v4466_v33, 4 }
 0x1eb   : > { %2994 = vmatprep.subr.bf16.mxu0 %v4139_v35  ;;  %v4841_v35 = vld [vmem:[#allocation26_spill] sm:$0xff] }
 0x1ec   : > { %2981 = vmatpush3.bf16.msra.mxu1 %v4141_v36  ;;  %v4842_v36 = vld [vmem:[#allocation27_spill] sm:$0xff] }
 0x1ed   : > { %3224 = vmatmul.mubr.bf16.vlgmr.msra.gmra.mrb[16].mxu0 %v4771_v30  ;;  %2982 = vmatprep.subr.bf16.mxu1 %v4160_v40  ;;  %v4858_v30 = vld [vmem:[#allocation39_spill] sm:$0xff] }
 0x1ee   : > { %2995 = vmatpush3.bf16.msra.mxu0 %v4149_v37  ;;  %1892 = vmatprep.mubr.bf16.mxu0 %v4840_v32  ;;  %v4843_v37 = vld [vmem:[#allocation20_spill] sm:$0xff]  ;;  %v4855_v32 = vld [vmem:[#allocation34_spill] sm:$0xff] }
 0x1ef   : > { %2996 = vmatprep.subr.bf16.mxu0 %v4152_v38  ;;  %v4844_v38 = vld [vmem:[#allocation21_spill] sm:$0xff] }
 0x1f0   : > { %2983 = vmatpush3.bf16.msra.mxu1 %v4162_v41 }
 0x1f1   : > { %2984 = vmatprep.subr.bf16.mxu1 %v4171_v44 }
 0x1f2   : > { %2997 = vmatpush3.bf16.msra.mxu0 %v4154_v39  ;;  %v4845_v39 = vld [vmem:[#allocation28_spill] sm:$0xff] }
 0x1f3   : > { %2998 = vmatprep.subr.bf16.mxu0 %v4165_v42 }
 0x1f4   : > { %2985 = vmatpush3.bf16.msra.mxu1 %v4174_v45 }
 0x1f5   : > { %2986 = vmatprep.subr.bf16.mxu1 %v4183_v48 }
 0x1f6   : > { %2999 = vmatpush3.bf16.msra.mxu0 %v4168_v43 }
 0x1f7   : > { %3000 = vmatprep.subr.bf16.mxu0 %v4177_v46 }
 0x1f8   : > { %2987 = vmatpush3.bf16.msra.mxu1 %v4186_v49 }
 0x1f9   : > { %3016 = vmatprep.subr.bf16.mxu1 %v4195_v52 }
 0x1fa   : > { %3001 = vmatpush3.bf16.msra.mxu0 %v4180_v47 }
 0x1fb   : > { %1853 = vmatmul.mubr.bf16.vlgmr.msra.gmra.mrb[28].mxu1 %v4302_v18  ;;  %3002 = vmatprep.subr.bf16.mxu0 %v4189_v50  ;;  %v4847_v18 = vld [vmem:[#allocation22_spill] sm:$0xff] }
 0x1fc   : > { %3017 = vmatpush3.bf16.msra.mxu1 %v4245_v4  ;;  %1932 = vmatprep.mubr.bf16.mxu1 %v4770_v34  ;;  %v4857_v34 = vld [vmem:[#allocation38_spill] sm:$0xff] }
 0x1fd   : > { %3018 = vmatprep.subr.bf16.mxu1 %v4247_v10 }
 0x1fe   : > { %3003 = vmatpush3.bf16.msra.mxu0 %v4192_v51 }
 0x1ff   : > { %3004 = vmatprep.subr.bf16.mxu0 %v4199_v53 }
 0x200   : > { %3019 = vmatpush3.bf16.msra.mxu1 %v4841_v35 }
 0x201   : > { %3020 = vmatprep.subr.bf16.mxu1 %v4842_v36 }
 0x202   : > { %3005 = vmatpush3.bf16.msra.mxu0 %v4843_v37 }
 0x203   : > { %3006 = vmatprep.subr.bf16.mxu0 %v4844_v38 }
 0x204   : > { %3021 = vmatpush3.bf16.msra.mxu1 %v4845_v39 }
 0x205   : > { %3022 = vmatprep.subr.bf16.mxu1 %v4846_v58 }
 0x206   : > { %3007 = vmatpush3.bf16.msra.mxu0 %v4847_v18 }
 0x207   : > { %3008 = vmatprep.subr.bf16.mxu0 %v4848_v29 }
 0x208   : > { %3023 = vmatpush3.bf16.msra.mxu1 %v4849_v6 }
 0x209   : > { %3024 = vmatprep.subr.bf16.mxu1 %v4850_v3 }
 0x20a   : > { %3009 = vmatpush3.bf16.msra.mxu0 %v4851_v61 }
 0x20b   : > { %3038 = vmatprep.subr.bf16.mxu0 %v4852_v63 }
 0x20c   : > { %3025 = vmatpush3.bf16.msra.mxu1 %v4853_v25 }
 0x20d   : > { %1893 = vmatmul.mubr.bf16.vlgmr.msra.gmra.mrb[20].mxu0 %v4466_v33  ;;  %3026 = vmatprep.subr.bf16.mxu1 %v4314_v9 }
 0x20e   : > { %3039 = vmatpush3.bf16.msra.mxu0 %v4854_v62  ;;  %1972 = vmatprep.mubr.bf16.mxu0 %v1812_v26  ;;  %v4856_v26 = vld [vmem:[#allocation40_spill] sm:$0xff] }
 0x20f   : > { %3040 = vmatprep.subr.bf16.mxu0 %v4855_v32 }
 0x210   : > { %3027 = vmatpush3.bf16.msra.mxu1 %v4327_v8 }
 0x211   : > { %3028 = vmatprep.subr.bf16.mxu1 %v4330_v60 }
 0x212   : > { %3041 = vmatpush3.bf16.msra.mxu0 %v4319_v14 }
 0x213   : > { %3042 = vmatprep.subr.bf16.mxu0 %v4322_v23 }
 0x214   : > { %3029 = vmatpush3.bf16.msra.mxu1 %v4339_v17 }
 0x215   : > { %3030 = vmatprep.subr.bf16.mxu1 %v4348_v21 }
 0x216   : > { %3043 = vmatpush3.bf16.msra.mxu0 %v4333_v20 }
 0x217   : > { %3044 = vmatprep.subr.bf16.mxu0 %v4336_v56 }
 0x218   : > { %3031 = vmatpush3.bf16.msra.mxu1 %v4363_v15 }
 0x219   : > { %3227 = vmatprep.subr.bf16.mxu1 %v4778_v13 }
 0x21a   : > { %3045 = vmatpush3.bf16.msra.mxu0 %v4354_v57 }
 0x21b   : > { %1933 = vmatmul.mubr.bf16.vlgmr.msra.gmra.mrb[32].mxu1 %v1810_v2  ;;  %3046 = vmatprep.subr.bf16.mxu0 %v4360_v54  ;;  %v4861_v2 = vld [vmem:[#allocation44_spill] sm:$0xff] }
 0x21c   : > { %3228 = vmatpush3.bf16.msra.mxu1 %v4856_v26  ;;  %3243 = vmatprep.mubr.msk.bf16.mxu1 %vm3784_vm3, %v4778_v13 }
 0x21d   : > { %3229 = vmatprep.subr.bf16.mxu1 %v4778_v13 }
 0x21e   : > { %3047 = vmatpush3.bf16.msra.mxu0 %v4857_v34 }
 0x21f   : > { %3048 = vmatprep.subr.bf16.mxu0 %v4858_v30 }
 0x220   : > { %3230 = vmatpush3.bf16.msra.mxu1 %v4385_v24  ;;  %v4776_v24 = vrot.slane %v4862_v28, 4 }
 0x221   : > { %3231 = vmatprep.subr.bf16.mxu1 %v4778_v13 }
 0x222   : > { %3049 = vmatpush3.bf16.msra.mxu0 %v4859_v22 }
 0x223   : > { %3050 = vmatprep.subr.bf16.mxu0 %v4860_v16 }
 0x224   : > { %3232 = vmatpush3.bf16.msra.mxu1 %v4399_v55  ;;  %v4863_v55 = vrot.slane %v4345_v0, 4  ;;  %v3524_v0 = vld [vmem:[#allocation8 + $0x10] sm:$0xff]  }
 0x225   : > { %3233 = vmatprep.subr.bf16.mxu1 %v4778_v13 }
 0x226   : > { %3051 = vmatpush3.bf16.msra.mxu0 %v4861_v2  ;;  %v3520_v2 = vld [vmem:[#allocation8] sm:$0xff]  }
 0x227   : > { %3052 = vmatprep.subr.bf16.mxu0 %v4396_v12 }
 0x228   : > { %3234 = vmatpush3.bf16.msra.mxu1 %v4407_v5  ;;  %v3521_v5 = vld [vmem:[#allocation8 + $0x48] sm:$0xff]  }
 0x229   : > { %3235 = vmatprep.subr.bf16.mxu1 %v4778_v13 }
 0x22a   : > { %3053 = vmatpush3.bf16.msra.mxu0 %v4403_v7 }
 0x22b   : > { %3069 = vmatprep.subr.bf16.mxu0 %v4414_v31  ;;  %v3522_v31 = vld [vmem:[#allocation8 + $0x8] sm:$0xff]  }
 0x22c   : > { %3236 = vmatpush3.bf16.msra.mxu1 %v4419_v11  ;;  %v3523_v11 = vld [vmem:[#allocation8 + $0x50] sm:$0xff]  }
 0x22d   : > { %1973 = vmatmul.mubr.bf16.vlgmr.msra.gmra.mrb[24].mxu0 %v4863_v55  ;;  %3237 = vmatprep.subr.bf16.mxu1 %v4778_v13  ;;  %v3525_v55 = vld [vmem:[#allocation8 + $0x58] sm:$0xff]  }
 0x22e   : > { %3070 = vmatpush3.bf16.msra.mxu0 %v3520_v2  ;;  %2092 = vmatprep.mubr.bf16.mxu0 %v4776_v24  ;;  %v4864_v2 = vld [vmem:[#allocation36_spill] sm:$0xff]  ;;  %v3526_v24 = vld [vmem:[#allocation8 + $0xc0] sm:$0xff]  }
 0x22f   : > { %3071 = vmatprep.subr.bf16.mxu0 %v3521_v5  ;;  %v1813_v5 = vrot.slane %v4864_v2, 4 }
 0x230   : > { %3238 = vmatpush3.bf16.msra.mxu1 %v4428_v59  ;;  %v3527_v59 = vld [vmem:[#allocation8 + $0x18] sm:$0xff]  }
 0x231   : > { %3239 = vmatprep.subr.bf16.mxu1 %v4778_v13 }
 0x232   : > { %3072 = vmatpush3.bf16.msra.mxu0 %v3522_v31  ;;  %v3529_v31 = vld [vmem:[#allocation8 + $0x80] sm:$0xff]  }
 0x233   : > { %3073 = vmatprep.subr.bf16.mxu0 %v3523_v11  ;;  %v3528_v11 = vld [vmem:[#allocation8 + $0x60] sm:$0xff]  }
 0x234   : > { %3240 = vmatpush3.bf16.msra.mxu1 %v4435_v19 }
 0x235   : > { %3241 = vmatprep.subr.bf16.mxu1 %v4778_v13  ;;  %v4865_v13 = vrot.slane %v4466_v33, 4 }
 0x236   : > { %3074 = vmatpush3.bf16.msra.mxu0 %v3524_v0  ;;  %v3530_v0 = vld [vmem:[#allocation8 + $0xc8] sm:$0xff]  }
 0x237   : > { %3075 = vmatprep.subr.bf16.mxu0 %v3525_v55  ;;  %v3531_v55 = vld [vmem:[#allocation8 + $0x20] sm:$0xff]  }
 0x238   : > { %3242 = vmatpush3.bf16.msra.mxu1 %v4441_v27  ;;  %v3532_v27 = vld [vmem:[#allocation8 + $0x88] sm:$0xff]  }
 0x239   : > { %3091 = vmatprep.subr.bf16.mxu1 %v3526_v24  ;;  %v3506_v24 = vld [vmem:[#allocation10 + $0x28] sm:$0xff]  }
 0x23a   : > { %3076 = vmatpush3.bf16.msra.mxu0 %v3527_v59  ;;  %v4630_v59 = vld [vmem:[%s4710_s6] ss:$0 sm:$0xff] }
 0x23b   : > { %3244 = vmatmul.mubr.bf16.vlgmr.msra.gmra.mrb[36].mxu1 %v1813_v5  ;;  %3077 = vmatprep.subr.bf16.mxu0 %v3528_v11 }
 0x23c   : > { %3092 = vmatpush3.bf16.msra.mxu1 %v3529_v31  ;;  %2132 = vmatprep.mubr.bf16.mxu1 %v4865_v13  ;;  %v4875_v13 = vld [vmem:[#allocation49_spill] sm:$0xff] }
 0x23d   : > { %3093 = vmatprep.subr.bf16.mxu1 %v3530_v0  ;;  %v3511_v0 = vld [vmem:[#allocation10 + $0x80] sm:$0xff]  }
 0x23e   : > { %3078 = vmatpush3.bf16.msra.mxu0 %v3531_v55  ;;  %v3512_v55 = vld [vmem:[#allocation10 + $0x88] sm:$0xff]  }
 0x23f   : > { %3079 = vmatprep.subr.bf16.mxu0 %v4160_v40  ;;  %v2025_v40 = vrot.slane %v4409_v1, 4 }
 0x240   : > { %3094 = vmatpush3.bf16.msra.mxu1 %v3532_v27 }
 0x241   : > { %3095 = vmatprep.subr.bf16.mxu1 %v4165_v42  ;;  %v2051_v42 = vrot.slane %v2025_v40, 4 }
 0x242   : > { %3080 = vmatpush3.bf16.msra.mxu0 %v4162_v41  ;;  %v4866_v41 = vld [vmem:[#allocation37_spill] sm:$0xff] }
 0x243   : > { %3081 = vmatprep.subr.bf16.mxu0 %v4171_v44  ;;  %v4867_v44 = vrot.slane %v4862_v28, 4 }
 0x244   : > { %3096 = vmatpush3.bf16.msra.mxu1 %v4168_v43  ;;  %v2052_v43 = vrot.slane %v4866_v41, 4 }
 0x245   : > { %3097 = vmatprep.subr.bf16.mxu1 %v4177_v46  ;;  %v4868_v46 = vmov 0.0  }
 0x246   : > { %3082 = vmatpush3.bf16.msra.mxu0 %v4174_v45  ;;  %v2050_v45 = vrot.slane %v4867_v44, 4 }
 0x247   : > { %3083 = vmatprep.subr.bf16.mxu0 %v4183_v48  ;;  %v4870_v48 = vld [vmem:[#allocation44_spill] sm:$0xff] }
 0x248   : > { %3098 = vmatpush3.bf16.msra.mxu1 %v4180_v47  ;;  %v4869_v47 = vld [vmem:[#allocation43_spill] sm:$0xff] }
 0x249   : > { %3099 = vmatprep.subr.bf16.mxu1 %v4189_v50  ;;  %v4871_v50 = vld [vmem:[#allocation45_spill] sm:$0xff] }
 0x24a   : > { %3084 = vmatpush3.bf16.msra.mxu0 %v4186_v49  ;;  %v3495_v49 = vld [vmem:[#allocation10 + $0x40] sm:$0xff]  }
 0x24b   : > { %3113 = vmatprep.subr.bf16.mxu0 %v4195_v52  ;;  %v3497_v52 = vld [vmem:[#allocation10 + $0x48] sm:$0xff]  }
 0x24c   : > { %3100 = vmatpush3.bf16.msra.mxu1 %v4192_v51  ;;  %v3496_v51 = vld [vmem:[#allocation10] sm:$0xff]  }
 0x24d   : > { %2093 = vmatmul.mubr.bf16.vlgmr.msra.gmra.mrb[28].mxu0 %v4466_v33  ;;  %3101 = vmatprep.subr.bf16.mxu1 %v4199_v53  ;;  %v4872_v53 = vld [vmem:[#allocation46_spill] sm:$0xff] }
 0x24e   : > { %3114 = vmatpush3.bf16.msra.mxu0 %v4245_v4  ;;  %2172 = vmatprep.mubr.bf16.mxu0 %v2051_v42  ;;  %v3498_v4 = vld [vmem:[#allocation10 + $0x8] sm:$0xff]   ;;  %v3513_v42 = vld [vmem:[#allocation10 + $0x90] sm:$0xff]  }
 0x24f   : > { %3115 = vmatprep.subr.bf16.mxu0 %v4247_v10  ;;  %v3499_v10 = vld [vmem:[#allocation10 + $0x50] sm:$0xff]  }
 0x250   : > { %3102 = vmatpush3.bf16.msra.mxu1 %v4843_v37  ;;  %v3509_v37 = vld [vmem:[#allocation10 + $0x78] sm:$0xff]  }
 0x251   : > { %3103 = vmatprep.subr.bf16.mxu1 %v4844_v38 }
 0x252   : > { %3116 = vmatpush3.bf16.msra.mxu0 %v4841_v35  ;;  %v3508_v35 = vld [vmem:[#allocation10 + $0x30] sm:$0xff]  }
 0x253   : > { %3117 = vmatprep.subr.bf16.mxu0 %v4842_v36 }
 0x254   : > { %3104 = vmatpush3.bf16.msra.mxu1 %v4847_v18 }
 0x255   : > { %3105 = vmatprep.subr.bf16.mxu1 %v4848_v29 }
 0x256   : > { %3118 = vmatpush3.bf16.msra.mxu0 %v4845_v39  ;;  %v3510_v39 = vld [vmem:[#allocation10 + $0x38] sm:$0xff]  }
 0x257   : > { %3119 = vmatprep.subr.bf16.mxu0 %v4846_v58 }
 0x258   : > { %3106 = vmatpush3.bf16.msra.mxu1 %v4851_v61 }
 0x259   : > { %3135 = vmatprep.subr.bf16.mxu1 %v4852_v63 }
 0x25a   : > { %3120 = vmatpush3.bf16.msra.mxu0 %v4849_v6 }
 0x25b   : > { %2133 = vmatmul.mubr.bf16.vlgmr.msra.gmra.mrb[40].mxu1 %v2025_v40  ;;  %3121 = vmatprep.subr.bf16.mxu0 %v4850_v3 }
 0x25c   : > { %3136 = vmatpush3.bf16.msra.mxu1 %v4854_v62  ;;  %2212 = vmatprep.mubr.bf16.mxu1 %v2052_v43 }
 0x25d   : > { %3137 = vmatprep.subr.bf16.mxu1 %v4855_v32 }
 0x25e   : > { %3122 = vmatpush3.bf16.msra.mxu0 %v4853_v25 }
 0x25f   : > { %3123 = vmatprep.subr.bf16.mxu0 %v4314_v9  ;;  %v4873_v9 = vld [vmem:[#allocation47_spill] sm:$0xff] }
 0x260   : > { %3138 = vmatpush3.bf16.msra.mxu1 %v4319_v14  ;;  %v3500_v14 = vld [vmem:[#allocation10 + $0x10] sm:$0xff]  }
 0x261   : > { %3139 = vmatprep.subr.bf16.mxu1 %v4322_v23 }
 0x262   : > { %3124 = vmatpush3.bf16.msra.mxu0 %v4327_v8  ;;  %v3501_v8 = vld [vmem:[#allocation10 + $0x58] sm:$0xff]  }
 0x263   : > { %3125 = vmatprep.subr.bf16.mxu0 %v4330_v60 }
 0x264   : > { %3140 = vmatpush3.bf16.msra.mxu1 %v4333_v20 }
 0x265   : > { %3141 = vmatprep.subr.bf16.mxu1 %v4336_v56  ;;  %v4874_v56 = vld [vmem:[#allocation48_spill] sm:$0xff] }
 0x266   : > { %3126 = vmatpush3.bf16.msra.mxu0 %v4339_v17 }
 0x267   : > { %3127 = vmatprep.subr.bf16.mxu0 %v4348_v21 }
 0x268   : > { %3142 = vmatpush3.bf16.msra.mxu1 %v4354_v57  ;;  %v3503_v57 = vld [vmem:[#allocation10 + $0x60] sm:$0xff]  }
 0x269   : > { %3143 = vmatprep.subr.bf16.mxu1 %v4360_v54  ;;  %v3504_v54 = vld [vmem:[#allocation10 + $0x20] sm:$0xff]  }
 0x26a   : > { %3128 = vmatpush3.bf16.msra.mxu0 %v4363_v15  ;;  %v3505_v15 = vld [vmem:[#allocation10 + $0x68] sm:$0xff]  }
 0x26b   : > { %3247 = vmatprep.subr.bf16.mxu0 %v4868_v46 }
 0x26c   : > { %3144 = vmatpush3.bf16.msra.mxu1 %v4857_v34 }
 0x26d   : > { %2173 = vmatmul.mubr.bf16.vlgmr.msra.gmra.mrb[32].mxu0 %v2050_v45  ;;  %3145 = vmatprep.subr.bf16.mxu1 %v4858_v30 }
 0x26e   : > { %3248 = vmatpush3.bf16.msra.mxu0 %v4856_v26  ;;  %3263 = vmatprep.mubr.msk.bf16.mxu0 %vm3784_vm3, %v4868_v46 }
 0x26f   : > { %3249 = vmatprep.subr.bf16.mxu0 %v4868_v46 }
 0x270   : > { %3146 = vmatpush3.bf16.msra.mxu1 %v4859_v22 }
 0x271   : > { %3147 = vmatprep.subr.bf16.mxu1 %v4860_v16 }
 0x272   : > { %3250 = vmatpush3.bf16.msra.mxu0 %v4869_v47  ;;  %v3514_v47 = vld [vmem:[#allocation10 + $0x98] sm:$0xff]  }
 0x273   : > { %3251 = vmatprep.subr.bf16.mxu0 %v4868_v46 }
 0x274   : > { %3148 = vmatpush3.bf16.msra.mxu1 %v4870_v48  ;;  %v3515_v48 = vld [vmem:[#allocation10 + $0xa0] sm:$0xff]  }
 0x275   : > { %3149 = vmatprep.subr.bf16.mxu1 %v4396_v12  ;;  %v3502_v12 = vld [vmem:[#allocation10 + $0x18] sm:$0xff]  }
 0x276   : > { %3252 = vmatpush3.bf16.msra.mxu0 %v4871_v50  ;;  %v3517_v50 = vld [vmem:[#allocation10 + $0xb0] sm:$0xff]  }
 0x277   : > { %3253 = vmatprep.subr.bf16.mxu0 %v4868_v46 }
 0x278   : > { %3150 = vmatpush3.bf16.msra.mxu1 %v4403_v7  ;;  %v4876_v7 = vld [vmem:[#allocation50_spill] sm:$0xff] }
 0x279   : > { %3166 = vmatprep.subr.bf16.mxu1 %v3495_v49  ;;  %v2053_v1 = vrot.slane %v4876_v7, 4  ;;  %v3516_v49 = vld [vmem:[#allocation10 + $0xa8] sm:$0xff]  }
 0x27a   : > { %3254 = vmatpush3.bf16.msra.mxu0 %v4872_v53 }
 0x27b   : > { %2213 = vmatmul.mubr.bf16.vlgmr.msra.gmra.mrb[44].mxu1 %v1813_v5  ;;  %3255 = vmatprep.subr.bf16.mxu0 %v4868_v46 }
 0x27c   : > { %3167 = vmatpush3.bf16.msra.mxu1 %v3496_v51 }
 0x27d   : > { %3168 = vmatprep.subr.bf16.mxu1 %v3497_v52 }
 0x27e   : > { %3256 = vmatpush3.bf16.msra.mxu0 %v4873_v9  ;;  %v3518_v9 = vld [vmem:[#allocation10 + $0xb8] sm:$0xff]  }
 0x27f   : > { %3257 = vmatprep.subr.bf16.mxu0 %v4868_v46 }
 0x280   : > { %v2891_v20 = vpop.f32.mrb[8].mxu0  ;;  %3169 = vmatpush3.bf16.msra.mxu1 %v3498_v4 }
 0x281   : > { %v2892_v23 = vpop.f32.mrb[9].mxu0  ;;  %3170 = vmatprep.subr.bf16.mxu1 %v3499_v10 }
 0x282   : > { %v2893_v60 = vadd.f32 %v2892_v23, %v2891_v20  ;;  %3258 = vmatpush3.bf16.msra.mxu0 %v4874_v56  ;;  %v2894_v17 = vpop.f32.mrb[10].mxu0 }
 0x283   : > { %v2895_v21 = vpop.f32.mrb[11].mxu0  ;;  %3259 = vmatprep.subr.bf16.mxu0 %v4868_v46 }
 0x284   : > { %3171 = vmatpush3.bf16.msra.mxu1 %v3500_v14  ;;  %v1615_v30 = vadd.f32 %v2893_v60, %v4630_v59 }
 0x285   : > { %3172 = vmatprep.subr.bf16.mxu1 %v3501_v8 }
 0x286   : > { %3260 = vmatpush3.bf16.msra.mxu0 %v4435_v19  ;;  %v3507_v19 = vld [vmem:[#allocation10 + $0x70] sm:$0xff]  }
 0x287   : > { %3261 = vmatprep.subr.bf16.mxu0 %v4868_v46 }
 0x288   : > { %3173 = vmatpush3.bf16.msra.mxu1 %v3502_v12 }
 0x289   : > { %3174 = vmatprep.subr.bf16.mxu1 %v3503_v57 }
 0x28a   : > { %3262 = vmatpush3.bf16.msra.mxu0 %v4875_v13 }
 0x28b   : > { %3267 = vmatprep.subr.bf16.mxu0 %v4868_v46 }
 0x28c   : > { %3175 = vmatpush3.bf16.msra.mxu1 %v3504_v54 }
 0x28d   : > { %3264 = vmatmul.mubr.bf16.vlgmr.msra.gmra.mrb[36].mxu0 %v2053_v1  ;;  %3176 = vmatprep.subr.bf16.mxu1 %v3505_v15 }
 0x28e   : > { %v2913_v27 = vpop.f32.mrb[20].mxu1  ;;  %3283 = vmatprep.mubr.msk.bf16.mxu0 %vm3784_vm3, %v4868_v46  ;;  %3268 = vmatpush3.bf16.msra.mxu0 %v3511_v0 }
 0x28f   : > { %v2914_v28 = vpop.f32.mrb[21].mxu1  ;;  %3269 = vmatprep.subr.bf16.mxu0 %v4868_v46 }
 0x290   : > { %v2915_v33 = vadd.f32 %v2914_v28, %v2913_v27  ;;  %v2916_v34 = vpop.f32.mrb[22].mxu1  ;;  %3177 = vmatpush3.bf16.msra.mxu1 %v3506_v24 }
 0x291   : > { %v2917_v36 = vpop.f32.mrb[23].mxu1  ;;  %3178 = vmatprep.subr.bf16.mxu1 %v3507_v19 }
 0x292   : > { %v1655_v38 = vadd.f32 %v2915_v33, %v1615_v30  ;;  %3270 = vmatpush3.bf16.msra.mxu0 %v3512_v55 }
 0x293   : > { %3271 = vmatprep.subr.bf16.mxu0 %v4868_v46 }
 0x294   : > { %3179 = vmatpush3.bf16.msra.mxu1 %v3508_v35 }
 0x295   : > { %3180 = vmatprep.subr.bf16.mxu1 %v3509_v37 }
 0x296   : > { %3272 = vmatpush3.bf16.msra.mxu0 %v3513_v42 }
 0x297   : > { %3273 = vmatprep.subr.bf16.mxu0 %v4868_v46 }
 0x298   : > { %3181 = vmatpush3.bf16.msra.mxu1 %v3510_v39 }
 0x29a   : > { %3274 = vmatpush3.bf16.msra.mxu0 %v3514_v47 }
 0x29b   : > { %3275 = vmatprep.subr.bf16.mxu0 %v4868_v46 }
 0x29e   : > { %3276 = vmatpush3.bf16.msra.mxu0 %v3515_v48 }
 0x29f   : > { %3277 = vmatprep.subr.bf16.mxu0 %v4868_v46 }
 0x2a0   : > { %v2935_v58 = vpop.f32.mrb[12].mxu0 }
 0x2a1   : > { %v2936_v18 = vpop.f32.mrb[13].mxu0 }
 0x2a2   : > { %v2937_v29 = vadd.f32 %v2936_v18, %v2935_v58  ;;  %v2938_v6 = vpop.f32.mrb[14].mxu0  ;;  %3278 = vmatpush3.bf16.msra.mxu0 %v3516_v49 }
 0x2a3   : > { %v2939_v3 = vpop.f32.mrb[15].mxu0  ;;  %3279 = vmatprep.subr.bf16.mxu0 %v4868_v46 }
 0x2a4   : > { %v1695_v61 = vadd.f32 %v2937_v29, %v1655_v38 }
 0x2a6   : > { %3280 = vmatpush3.bf16.msra.mxu0 %v3517_v50 }
 0x2a7   : > { %3281 = vmatprep.subr.bf16.mxu0 %v4868_v46 }
 0x2aa   : > { %3282 = vmatpush3.bf16.msra.mxu0 %v3518_v9 }
 0x2ae   : > { %v2957_v63 = vpop.f32.mrb[24].mxu1 }
 0x2af   : > { %v2958_v25 = vpop.f32.mrb[25].mxu1 }
 0x2b0   : > { %v2959_v62 = vadd.f32 %v2958_v25, %v2957_v63  ;;  %v2960_v32 = vpop.f32.mrb[26].mxu1 }
 0x2b1   : > { %v2961_v26 = vpop.f32.mrb[27].mxu1 }
 0x2b2   : > { %v1735_v22 = vadd.f32 %v2959_v62, %v1695_v61 }
 0x2c0   : > { %v1774_v16 = vpop.f32.mrb[16].mxu0 }
 0x2c1   : > { %v1775_v2 = vadd.f32 %v1774_v16, %v1735_v22  ;;  %v3225_v5 = vpop.f32.mrb[17].mxu0 }
 0x2c2   : > { %v1777_v11 = vpop.f32.mrb[18].mxu0 }
 0x2c3   : > { %v3226_v31 = vpop.f32.mrb[19].mxu0  ;;  %v1780_v19 = vmax.f32 %v1775_v2, 0.0 }
 0x2c5   : > { %v1781_v34 = vpack.c.bf16 %v1780_v19, %v1780_v19 }
 0x2ce   : > { %v2988_v40 = vpop.f32.mrb[28].mxu1 }
 0x2cf   : > { %v2989_v41 = vpop.f32.mrb[29].mxu1 }
 0x2d0   : > { %v2990_v43 = vadd.f32 %v2989_v41, %v2988_v40  ;;  %v2991_v44 = vpop.f32.mrb[30].mxu1 }
 0x2d1   : > { %v2992_v45 = vpop.f32.mrb[31].mxu1 }
 0x2d2   : > { %v1855_v53 = vadd.f32 %v2990_v43, %v4630_v59 }
 0x2e0   : > { %v3010_v51 = vpop.f32.mrb[20].mxu0 }
 0x2e1   : > { %v3011_v52 = vpop.f32.mrb[21].mxu0 }
 0x2e2   : > { %v3012_v4 = vadd.f32 %v3011_v52, %v3010_v51  ;;  %v3013_v10 = vpop.f32.mrb[22].mxu0  ;;  %v2841_v52 = vld [vmem:[%s4877_s28] ss:$0 sm:$0xff] }
 0x2e3   : > { %v3014_v20 = vpop.f32.mrb[23].mxu0 }
 0x2e4   : > { %v1895_v14 = vadd.f32 %v3012_v4, %v1855_v53  ;;  %v2542_v20 = vld [vmem:[%s4878_s13] sm:$0xff] }
 0x2ee   : > { %v3032_v23 = vpop.f32.mrb[32].mxu1 }
 0x2ef   : > { %v3033_v8 = vpop.f32.mrb[33].mxu1 }
 0x2f0   : > { %v3034_v60 = vadd.f32 %v3033_v8, %v3032_v23  ;;  %v3035_v56 = vpop.f32.mrb[34].mxu1 }
 0x2f1   : > { %v3036_v17 = vpop.f32.mrb[35].mxu1 }
 0x2f2   : > { %v1935_v21 = vadd.f32 %v3034_v60, %v1895_v14 }
 0x300   : > { %v3054_v12 = vpop.f32.mrb[24].mxu0 }
 0x301   : > { %v3055_v57 = vpop.f32.mrb[25].mxu0 }
 0x302   : > { %v3056_v54 = vadd.f32 %v3055_v57, %v3054_v12  ;;  %v3057_v15 = vpop.f32.mrb[26].mxu0 }
 0x303   : > { %v3058_v13 = vpop.f32.mrb[27].mxu0 }
 0x304   : > { %v1975_v46 = vadd.f32 %v3056_v54, %v1935_v21 }
 0x30e   : > { %v2014_v7 = vpop.f32.mrb[36].mxu1 }
 0x30f   : > { %v2015_v1 = vadd.f32 %v2014_v7, %v1975_v46  ;;  %v3245_v24 = vpop.f32.mrb[37].mxu1 }
 0x310   : > { %v2017_v27 = vpop.f32.mrb[38].mxu1 }
 0x311   : > { %v2020_v28 = vmax.f32 %v2015_v1, 0.0  ;;  %v3246_v30 = vpop.f32.mrb[39].mxu1 }
 0x313   : > { %v2021_v33 = vpack.c.bf16 %v2020_v28, %v2020_v28 }
 0x315   : > { %2493 = vmatprep.mubr.bf16.mxu1 %v2021_v33 }
 0x316   : > { %2494 = vmatmul.mubr.bf16.vlgmr.msra.gmra.mrb[48].mxu1 %v1781_v34 }
 0x320   : > { %v3085_v35 = vpop.f32.mrb[28].mxu0 }
 0x321   : > { %v3086_v36 = vpop.f32.mrb[29].mxu0 }
 0x322   : > { %v3087_v37 = vadd.f32 %v3086_v36, %v3085_v35  ;;  %v3088_v38 = vpop.f32.mrb[30].mxu0 }
 0x323   : > { %v3089_v39 = vpop.f32.mrb[31].mxu0 }
 0x324   : > { %v2095_v29 = vadd.f32 %v3087_v37, %v4630_v59 }
 0x32e   : > { %v3107_v58 = vpop.f32.mrb[40].mxu1 }
 0x32f   : > { %v3108_v18 = vpop.f32.mrb[41].mxu1 }
 0x330   : > { %v3109_v6 = vadd.f32 %v3108_v18, %v3107_v58  ;;  %v3110_v3 = vpop.f32.mrb[42].mxu1 }
 0x331   : > { %v3111_v61 = vpop.f32.mrb[43].mxu1 }
 0x332   : > { %v2135_v63 = vadd.f32 %v3109_v6, %v2095_v29 }
 0x340   : > { %v3129_v25 = vpop.f32.mrb[32].mxu0 }
 0x341   : > { %v3130_v62 = vpop.f32.mrb[33].mxu0 }
 0x342   : > { %v3131_v32 = vadd.f32 %v3130_v62, %v3129_v25  ;;  %v3132_v26 = vpop.f32.mrb[34].mxu0 }
 0x343   : > { %v3133_v22 = vpop.f32.mrb[35].mxu0 }
 0x344   : > { %v2175_v16 = vadd.f32 %v3131_v32, %v2135_v63 }
 0x34e   : > { %v3151_v2 = vpop.f32.mrb[44].mxu1 }
 0x34f   : > { %v3152_v5 = vpop.f32.mrb[45].mxu1 }
 0x350   : > { %v3153_v11 = vadd.f32 %v3152_v5, %v3151_v2  ;;  %v3154_v31 = vpop.f32.mrb[46].mxu1 }
 0x351   : > { %v3155_v0 = vpop.f32.mrb[47].mxu1 }
 0x352   : > { %v2215_v55 = vadd.f32 %v3153_v11, %v2175_v16 }
 0x360   : > { %v2254_v40 = vpop.f32.mrb[36].mxu0 }
 0x361   : > { %v2255_v42 = vadd.f32 %v2254_v40, %v2215_v55  ;;  %v3265_v59 = vpop.f32.mrb[37].mxu0 }
 0x362   : > { %v2257_v41 = vpop.f32.mrb[38].mxu0 }
 0x363   : > { %v2260_v43 = vmax.f32 %v2255_v42, 0.0  ;;  %v3266_v44 = vpop.f32.mrb[39].mxu0 }
 0x365   : > { %v2261_v45 = vpack.c.bf16 %v2260_v43, %v2260_v43 }
 0x367   : > { %3284 = vmatmul.mubr.bf16.vlgmr.msra.gmra.mrb[40].mxu0 %v2261_v45 }
 0x3e9   : > { %v3182_v47 = vpop.f32.mrb[48].mxu1 }
 0x3ea   : > { %v3183_v48 = vpop.f32.mrb[49].mxu1 }
 0x3eb   : > { %v3184_v49 = vadd.f32 %v3183_v48, %v3182_v47  ;;  %v3185_v50 = vpop.f32.mrb[50].mxu1 }
 0x3ec   : > { %v3186_v51 = vpop.f32.mrb[51].mxu1 }
 0x3ed   : > { %v2496_v53 = vadd.f32 %v3184_v49, %v2841_v52 }
 0x43a   : > { %v2535_v4 = vpop.f32.mrb[40].mxu0 }
 0x43b   : > { %v2536_v10 = vadd.f32 %v2535_v4, %v2496_v53  ;;  %v3285_v9 = vpop.f32.mrb[41].mxu0 }
 0x43c   : > { %v2538_v14 = vpop.f32.mrb[42].mxu0 }
 0x43d   : > { %v2541_v23 = vmul.f32 5.656854, %v2536_v10  ;;  %v3286_v8 = vpop.f32.mrb[43].mxu0 }
 0x43f   : > { %v2543_v60 = vadd.f32 %v2542_v20, %v2541_v23 }
 0x441   : > { %2544 = vst [vmem:[%s506_s9] sm:$0xff] %v2543_v60 }
 0x442   : > { %3690 = shalt.err (!%p3687_p6)
}
 0x443   : > { %s3691_s27 = scalar_lea.hbm %s4655_s26, 128  ;;  %s3695_s28 = scalar_lea.hbm %s4879_s7, 256 }
 0x444   : > { %p3692_p12 = scmp.ne.s32.totalorder %s4655_s26, %s3691_s27  ;;  %p3696_p5 = scmp.lt.u32.totalorder %s4655_s26, %s4879_s7 }
 0x445   : > { %p3697_p9 = scmp.lt.u32.totalorder %s3695_s28, %s3691_s27  ;;  %p3699_p1 = scmp.lt.u32.totalorder %s3691_s27, %s4655_s26 }
 0x446   : > { %p3693_p3 = pnand %p3692_p12, %p4880_p4 }
 0x447   : > { %p3698_p0 = por %p3697_p9, %p3696_p5 }
 0x448   : > { %p3694_p7 = pneg %p3693_p3 }
 0x449   : > { %p3700_p8 = por %p3699_p1, %p3698_p0 }
 0x44b   : > { %p3701_p2 = pnand %p3700_p8, %p3694_p7 }
 0x44d   : > { %3704 = shalt.err (!%p3701_p2)
}
 0x44e   : > { %3303 = dma.vmem_to_hbm [thread:$0]  (%p4880_p4), %s4657_s23, 128, %s4655_s26, %s2546_s8  }
 0x44f PF: > { %s4881_s25 = sld [smem:[#allocation17_spill]]  ;;  %s4882_s13 = sld [smem:[#allocation18_spill]] }
 0x450   : > { %p4884_p10 = scmp.ge.s32.totalorder %s3771_s18, 2 }
 0x455   : > { %s2572_s10 = sand.u32 1, %s4881_s25   ;;  %p4883_p13 = scmp.ne.s32.totalorder %s4882_s13, 0 }
 0x456   : > { %s2573_s9 = scalar_lea.sflag [#allocation4], %s2572_s10 }
 0x457   : > { %p3323_p11 = pnand %p4884_p10, %p4883_p13 }
 0x459   : > { %3746 = dma.done.wait (!%p3323_p11), %s2573_s9, 128  }
 0x45a   : > { %3748 = vsyncadd (!%p3323_p11), %s2573_s9, 4294967168  ;;  %s30_s18 = sadd.s32 1, %s3771_s18   ;;  %s4885_s30 = sld [smem:[#allocation19_spill]] }
 0x45b   : > { %p27_p6 = scmp.ge.s32.totalorder %s30_s18, 4   ;;  %s4886_s13 = smov %s3755_s14 }
 0x45c   : > { %s4887_s14 = smov %s3759_s15  ;;  %s4888_s15 = smov %s4002_s11 }
 0x45d   : > { %s4889_s16 = smov %s3767_s17  ;;  %29 = sbr.rel (!%p27_p6) target bundleno = 16 (0x10), region = 136 }
 0x460   : > { %s4890_s17 = smov %s4885_s30 }
 0x464   :  { %2578 = vsyncpa [#allocation3], 1 }
 0x465   :  { %2580 = vsyncpa [#allocation3 + $0x1], 1 }
 0x466   :  { %2581 = vsyncpa [#allocation6], 1 }
 0x467   :  { %2583 = vsyncpa [#allocation6 + $0x1], 1 }
 0x468   :  { %2584 = vsyncpa [#allocation9], 1 }
 0x469   :  { %2585 = vsyncpa [#allocation4], 1 }
 0x46a   :  { %2587 = vsyncpa [#allocation4 + $0x1], 1 }

</bundles_post_ra>
